<compile_context>
chip_gen: v7x
topology: tpu7x:2x2x1
jax: 0.10.0
libtpu: 0.0.40
codegen_flags: <defaults>
</compile_context>

<pallas_src>
import jax
import jax.numpy as jnp
from jax.experimental import pallas as pl
from jax.experimental.pallas import tpu as pltpu


def _round_up(x, m):
    return ((x + m - 1) // m) * m


def _eviction_kernel(
    pcad_ref, cl_ref, mask_ref,            # per-batch-tile tensors, (features, tb)
    w1t_ref, b1t_ref, w2t_ref, b2t_ref,    # shared MLP (bf16 W, f32 bias columns)
    wclt_ref, wht_ref, bht_ref,            # fused heads, layer 1 (block-diagonal)
    w2bt_ref, b2bt_ref,                    # fused heads, layer 2
    out_ref,                               # (2L, tb) = [probs ; reuse distances]
):
    f32 = jnp.float32
    bf16 = jnp.bfloat16
    L = mask_ref.shape[0]

    # ---- shared MLP: Linear -> Tanh -> Linear -> Tanh (pc|addr concat done in wrapper) ----
    h = jnp.tanh(jnp.dot(w1t_ref[...], pcad_ref[...], preferred_element_type=f32)
                 + b1t_ref[...])
    h = jnp.tanh(jnp.dot(w2t_ref[...], h.astype(bf16), preferred_element_type=f32)
                 + b2t_ref[...])                                         # (H, tb) f32

    # ---- fused heads, layer 1: one block-diagonal MXU matmul over all cache lines ----
    a = jnp.maximum(
        jnp.dot(wclt_ref[...], cl_ref[...], preferred_element_type=f32)
        + jnp.dot(wht_ref[...], h.astype(bf16), preferred_element_type=f32)
        + bht_ref[...], 0.0)                                             # (L*2H, tb) f32

    # ---- fused heads, layer 2: MXU matmul straight to the lane-dense output slab ----
    rr = jnp.maximum(
        jnp.dot(w2bt_ref[...], a.astype(bf16), preferred_element_type=f32)
        + b2bt_ref[...], 0.0)                                            # (2L, tb) f32

    raw = rr[:L]                         # cache-line scorer logits, (L, tb)
    reuse = rr[L:]                       # reuse-distance estimates,  (L, tb)

    # ---- softmax over cache lines (sublane axis), then utils.mask_renormalize ----
    m = jnp.max(raw, axis=0, keepdims=True)
    e = jnp.exp(raw - m)
    scores = e * pl.reciprocal(jnp.sum(e, axis=0, keepdims=True), approx=True)
    masked = scores * mask_ref[...]
    probs = masked / jnp.sum(masked, axis=0, keepdims=True)   # exact final renormalize

    out_ref[:L, :] = probs
    out_ref[L:, :] = reuse


def pack_params(params, num_cache_lines):
    """One-time packing: fuse the two heads, build the block-diagonal per-line weights,
    pre-transpose everything to (out_features, in_features) for the feature-major kernel,
    and cast MXU-side weights to bf16."""
    L = num_cache_lines
    bf16, f32 = jnp.bfloat16, jnp.float32
    H = params["w2"].shape[0]

    # heads fused along the output dim: [scorer | reuse-distance estimator]
    wh1h = jnp.concatenate([params["ws1h"], params["wr1h"]], -1)      # (H,   2H)
    wh1c = jnp.concatenate([params["ws1c"], params["wr1c"]], -1)      # (Dcl, 2H)
    bh1 = jnp.concatenate([params["bs1"], params["br1"]], -1)         # (1,   2H)

    eyeL = jnp.eye(L, dtype=f32)
    # layer 1: block-diagonal over cache lines for the packed cl lanes, wh1h replicated
    wcl_big = jnp.kron(eyeL, wh1c)                                    # (L*Dcl, L*2H)
    wh_big = jnp.tile(wh1h, (1, L))                                   # (H,     L*2H)
    bh_big = jnp.tile(bh1, (1, L))                                    # (1,     L*2H)
    # layer 2: per-line scorer / reuse dot products as one (L*2H, 2L) matmul
    ws2_col = jnp.concatenate([params["ws2"][0], jnp.zeros((H,), f32)])[:, None]  # (2H,1)
    wr2_col = jnp.concatenate([jnp.zeros((H,), f32), params["wr2"][0]])[:, None]  # (2H,1)
    w2_big = jnp.concatenate([jnp.kron(eyeL, ws2_col),
                              jnp.kron(eyeL, wr2_col)], axis=1)       # (L*2H, 2L)
    b2_big = jnp.concatenate([jnp.full((1, L), params["bs2"][0, 0]),
                              jnp.full((1, L), params["br2"][0, 0])], -1)  # (1, 2L)

    return {
        "w1t": params["w1"].T.astype(bf16), "b1t": params["b1"].T.astype(f32),
        "w2t": params["w2"].T.astype(bf16), "b2t": params["b2"].T.astype(f32),
        "wclt": wcl_big.T.astype(bf16), "wht": wh_big.T.astype(bf16),
        "bht": bh_big.T.astype(f32),
        "w2bt": w2_big.T.astype(bf16), "b2bt": b2_big.T.astype(f32),
    }


def eviction_policy_forward(pc_emb, addr_emb, cl_emb, mask, packed, *, batch_tile=2048):
    """Runs the EvictionPolicyModel forward. Returns (probs, pred_reuse_distances)."""
    B, L, d_cl = cl_emb.shape
    d_in = pc_emb.shape[-1] + addr_emb.shape[-1]
    h2 = packed["wht"].shape[0]          # = L * 2 * mlp_hidden_size

    # ---- feature-major (lane-dense) inputs; one fused cast/transpose pass each ----
    pcad_t = jnp.concatenate([pc_emb, addr_emb], -1).T.astype(jnp.bfloat16)   # (Din,   B)
    cl_t = cl_emb.reshape(B, L * d_cl).T.astype(jnp.bfloat16)                 # (L*Dcl, B)
    mask_t = mask.T.astype(jnp.float32)                                       # (L,     B)

    # ---- tile selection: large tiles amortize the ~0.35us/step pipeline overhead,
    # batch is PADDED to a tile multiple (no divisor-shrinking fallback), and mid-size
    # batches are split into 2 tiles so v7x's two TensorCores both get work. ----
    batch_tile = max(128, (batch_tile // 128) * 128)
    if B > batch_tile:
        tb = batch_tile
    elif B >= 1024:
        tb = _round_up(-(-B // 2), 128)          # two tiles
    else:
        tb = _round_up(B, 8)                     # single small tile
    b_pad = _round_up(B, tb)
    grid = (b_pad // tb,)

    if b_pad != B:
        pad = ((0, 0), (0, b_pad - B))
        pcad_t = jnp.pad(pcad_t, pad)
        cl_t = jnp.pad(cl_t, pad)
        mask_t = jnp.pad(mask_t, pad)            # padded columns -> NaN probs, sliced off

    def tile_spec(rows):
        return pl.BlockSpec((rows, tb), lambda i: (0, i))

    def resident(arr):    # weights: same block every step -> stays resident in VMEM
        return pl.BlockSpec(arr.shape, lambda i: (0, 0))

    weight_names = ("w1t", "b1t", "w2t", "b2t", "wclt", "wht", "bht", "w2bt", "b2bt")
    weights = [packed[n] for n in weight_names]

    in_specs = [tile_spec(d_in), tile_spec(L * d_cl), tile_spec(L)]
    in_specs += [resident(w) for w in weights]

    # rough per-tile VMEM need: double-buffered I/O + f32/bf16 intermediates + headroom
    per_row = 2 * (2 * d_in + 2 * L * d_cl + 4 * L + 8 * L) + 7 * h2
    vmem_limit = int(min(100 << 20, max(32 << 20, tb * per_row + (4 << 20))))

    out = pl.pallas_call(
        _eviction_kernel,
        grid=grid,
        in_specs=in_specs,
        out_specs=pl.BlockSpec((2 * L, tb), lambda i: (0, i)),
        out_shape=jax.ShapeDtypeStruct((2 * L, b_pad), jnp.float32),
        compiler_params=pltpu.CompilerParams(
            dimension_semantics=("parallel",),       # shards batch tiles across v7x's 2 TCs
            vmem_limit_bytes=vmem_limit),
    )(pcad_t, cl_t, mask_t, *weights)

    # Consumers that can work feature-major should take `out` directly
    # (rows [0:L] = probs, rows [L:2L] = reuse distances); here we hand back the
    # module's batch-major view.
    probs = out[:L, :B].T
    reuse = out[L:, :B].T
    return probs, reuse


def _reference(pc_emb, addr_emb, cl_emb, mask, p):
    # pure-JAX f32 reference mirroring the PyTorch forward
    x = jnp.concatenate([pc_emb, addr_emb], -1)
    h = jnp.tanh(x @ p["w1"] + p["b1"])
    h = jnp.tanh(h @ p["w2"] + p["b2"])
    B, L, _ = cl_emb.shape
    ctx_h = jnp.broadcast_to(h[:, None, :], (B, L, h.shape[-1]))

    def head(w1h, w1c, b1, w2, b2):
        a = jnp.maximum(ctx_h @ w1h + cl_emb @ w1c + b1, 0.0)
        return jnp.maximum(jnp.sum(a * w2[None, :, :], -1) + b2[0, 0], 0.0)

    raw = head(p["ws1h"], p["ws1c"], p["bs1"], p["ws2"], p["bs2"])
    reuse = head(p["wr1h"], p["wr1c"], p["br1"], p["wr2"], p["br2"])
    sm = jax.nn.softmax(raw, -1)
    masked = sm * mask
    return masked / jnp.sum(masked, -1, keepdims=True), reuse


if __name__ == "__main__":
    B, L = 2, 8                 # batch size, num cache lines
    D_pc, D_addr, D_cl = 16, 16, 16
    H = 32                      # mlp_hidden_size
    D_in = D_pc + D_addr

    key = jax.random.PRNGKey(0)
    ks = jax.random.split(key, 20)

    def rnd(k, shape, scale=0.1):
        return scale * jax.random.normal(k, shape, dtype=jnp.float32)

    params = {
        # _mlp
        "w1": rnd(ks[0], (D_in, H)), "b1": rnd(ks[1], (1, H)),
        "w2": rnd(ks[2], (H, H)),    "b2": rnd(ks[3], (1, H)),
        # _cache_line_scorer: Linear(H + D_cl, H) split into H / D_cl parts, then Linear(H, 1)
        "ws1h": rnd(ks[4], (H, H)), "ws1c": rnd(ks[5], (D_cl, H)), "bs1": rnd(ks[6], (1, H)),
        "ws2": rnd(ks[7], (1, H)),  "bs2": rnd(ks[8], (1, 1)),
        # _reuse_distance_estimator: same architecture
        "wr1h": rnd(ks[9], (H, H)), "wr1c": rnd(ks[10], (D_cl, H)), "br1": rnd(ks[11], (1, H)),
        "wr2": rnd(ks[12], (1, H)), "br2": rnd(ks[13], (1, 1)),
    }

    pc_emb = rnd(ks[14], (B, D_pc), 1.0)
    addr_emb = rnd(ks[15], (B, D_addr), 1.0)
    cl_emb = rnd(ks[16], (B, L, D_cl), 1.0)
    # mask from utils.pad: 1 for real lines, 0 for padding (last 2 lines of batch 1 padded)
    mask = jnp.ones((B, L), dtype=jnp.float32).at[1, 6:].set(0.0)

    packed = pack_params(params, L)
    fwd = jax.jit(eviction_policy_forward)
    probs, reuse = fwd(pc_emb, addr_emb, cl_emb, mask, packed)
    jax.block_until_ready((probs, reuse))

    ref_probs, ref_reuse = _reference(pc_emb, addr_emb, cl_emb, mask, params)
    # bf16 MXU matmuls + approx softmax reciprocal => looser tolerance than pure-f32
    assert jnp.allclose(probs, ref_probs, atol=2e-2, rtol=2e-2)
    assert jnp.allclose(reuse, ref_reuse, atol=2e-2, rtol=2e-2)

    # TODO(synk): the external embedder modules (pc/address/cache-line embedders),
    # utils.pad of ragged cache-line lists, the training-time loss() loop, and the
    # reuse_dist-only probs override branch are outside this forward-pass kernel.
    print("KERNEL_OK")
</pallas_src>

<mosaic_0001>
module attributes {stable_mosaic.version = 11 : i64} {
  func.func @_eviction_kernel(%arg0: i32, %arg1: memref<32x8xbf16, #tpu.memory_space<vmem>>, %arg2: memref<128x8xbf16, #tpu.memory_space<vmem>>, %arg3: memref<8x8xf32, #tpu.memory_space<vmem>>, %arg4: memref<32x32xbf16, #tpu.memory_space<vmem>>, %arg5: memref<32x1xf32, #tpu.memory_space<vmem>>, %arg6: memref<32x32xbf16, #tpu.memory_space<vmem>>, %arg7: memref<32x1xf32, #tpu.memory_space<vmem>>, %arg8: memref<512x128xbf16, #tpu.memory_space<vmem>>, %arg9: memref<512x32xbf16, #tpu.memory_space<vmem>>, %arg10: memref<512x1xf32, #tpu.memory_space<vmem>>, %arg11: memref<16x512xbf16, #tpu.memory_space<vmem>>, %arg12: memref<16x1xf32, #tpu.memory_space<vmem>>, %arg13: memref<16x8xf32, #tpu.memory_space<vmem>>) attributes {dimension_semantics = [#tpu.dimension_semantics<parallel>], iteration_bounds = array<i64: 1>, scalar_prefetch = 0 : i64, scratch_operands = 0 : i64, tpu.core_type = #tpu.core_type<tc>, window_params = [{transform_indices = @transform_0, window_bounds = array<i64: 32, 8>}, {transform_indices = @transform_1, window_bounds = array<i64: 128, 8>}, {transform_indices = @transform_2, window_bounds = array<i64: 8, 8>}, {pipeline_mode = #tpu.pipeline_mode<synchronous>, transform_indices = @transform_3, window_bounds = array<i64: 32, 32>}, {pipeline_mode = #tpu.pipeline_mode<synchronous>, transform_indices = @transform_4, window_bounds = array<i64: 32, 1>}, {pipeline_mode = #tpu.pipeline_mode<synchronous>, transform_indices = @transform_5, window_bounds = array<i64: 32, 32>}, {pipeline_mode = #tpu.pipeline_mode<synchronous>, transform_indices = @transform_6, window_bounds = array<i64: 32, 1>}, {pipeline_mode = #tpu.pipeline_mode<synchronous>, transform_indices = @transform_7, window_bounds = array<i64: 512, 128>}, {pipeline_mode = #tpu.pipeline_mode<synchronous>, transform_indices = @transform_8, window_bounds = array<i64: 512, 32>}, {pipeline_mode = #tpu.pipeline_mode<synchronous>, transform_indices = @transform_9, window_bounds = array<i64: 512, 1>}, {pipeline_mode = #tpu.pipeline_mode<synchronous>, transform_indices = @transform_10, window_bounds = array<i64: 16, 512>}, {pipeline_mode = #tpu.pipeline_mode<synchronous>, transform_indices = @transform_11, window_bounds = array<i64: 16, 1>}, {transform_indices = @transform_12, window_bounds = array<i64: 16, 8>}]} {
    %c0 = arith.constant 0 : index
    %c0_0 = arith.constant 0 : index
    %0 = vector.load %arg4[%c0, %c0_0] : memref<32x32xbf16, #tpu.memory_space<vmem>>, vector<32x32xbf16>
    %c0_1 = arith.constant 0 : index
    %c0_2 = arith.constant 0 : index
    %1 = vector.load %arg1[%c0_1, %c0_2] : memref<32x8xbf16, #tpu.memory_space<vmem>>, vector<32x8xbf16>
    %cst = arith.constant dense<0.000000e+00> : vector<32x8xf32>
    %2 = tpu.matmul %0, %1, %cst {dimension_numbers = #tpu.dot_dimension_numbers<[1], [0], [0], [1], [0, 0, 1, 1], [], []>} : vector<32x32xbf16>, vector<32x8xbf16>, vector<32x8xf32> -> vector<32x8xf32>
    %c0_3 = arith.constant 0 : index
    %c0_4 = arith.constant 0 : index
    %3 = vector.load %arg5[%c0_3, %c0_4] : memref<32x1xf32, #tpu.memory_space<vmem>>, vector<32x1xf32>
    %4 = vector.broadcast %3 : vector<32x1xf32> to vector<32x8xf32>
    %5 = arith.addf %2, %4 : vector<32x8xf32>
    %6 = math.tanh %5 : vector<32x8xf32>
    %c0_5 = arith.constant 0 : index
    %c0_6 = arith.constant 0 : index
    %7 = vector.load %arg6[%c0_5, %c0_6] : memref<32x32xbf16, #tpu.memory_space<vmem>>, vector<32x32xbf16>
    %8 = arith.truncf %6 : vector<32x8xf32> to vector<32x8xbf16>
    %cst_7 = arith.constant dense<0.000000e+00> : vector<32x8xf32>
    %9 = tpu.matmul %7, %8, %cst_7 {dimension_numbers = #tpu.dot_dimension_numbers<[1], [0], [0], [1], [0, 0, 1, 1], [], []>} : vector<32x32xbf16>, vector<32x8xbf16>, vector<32x8xf32> -> vector<32x8xf32>
    %c0_8 = arith.constant 0 : index
    %c0_9 = arith.constant 0 : index
    %10 = vector.load %arg7[%c0_8, %c0_9] : memref<32x1xf32, #tpu.memory_space<vmem>>, vector<32x1xf32>
    %11 = vector.broadcast %10 : vector<32x1xf32> to vector<32x8xf32>
    %12 = arith.addf %9, %11 : vector<32x8xf32>
    %13 = math.tanh %12 : vector<32x8xf32>
    %c0_10 = arith.constant 0 : index
    %c0_11 = arith.constant 0 : index
    %14 = vector.load %arg8[%c0_10, %c0_11] : memref<512x128xbf16, #tpu.memory_space<vmem>>, vector<512x128xbf16>
    %c0_12 = arith.constant 0 : index
    %c0_13 = arith.constant 0 : index
    %15 = vector.load %arg2[%c0_12, %c0_13] : memref<128x8xbf16, #tpu.memory_space<vmem>>, vector<128x8xbf16>
    %cst_14 = arith.constant dense<0.000000e+00> : vector<512x8xf32>
    %16 = tpu.matmul %14, %15, %cst_14 {dimension_numbers = #tpu.dot_dimension_numbers<[1], [0], [0], [1], [0, 0, 1, 1], [], []>} : vector<512x128xbf16>, vector<128x8xbf16>, vector<512x8xf32> -> vector<512x8xf32>
    %c0_15 = arith.constant 0 : index
    %c0_16 = arith.constant 0 : index
    %17 = vector.load %arg9[%c0_15, %c0_16] : memref<512x32xbf16, #tpu.memory_space<vmem>>, vector<512x32xbf16>
    %18 = arith.truncf %13 : vector<32x8xf32> to vector<32x8xbf16>
    %cst_17 = arith.constant dense<0.000000e+00> : vector<512x8xf32>
    %19 = tpu.matmul %17, %18, %cst_17 {dimension_numbers = #tpu.dot_dimension_numbers<[1], [0], [0], [1], [0, 0, 1, 1], [], []>} : vector<512x32xbf16>, vector<32x8xbf16>, vector<512x8xf32> -> vector<512x8xf32>
    %20 = arith.addf %16, %19 : vector<512x8xf32>
    %c0_18 = arith.constant 0 : index
    %c0_19 = arith.constant 0 : index
    %21 = vector.load %arg10[%c0_18, %c0_19] : memref<512x1xf32, #tpu.memory_space<vmem>>, vector<512x1xf32>
    %22 = vector.broadcast %21 : vector<512x1xf32> to vector<512x8xf32>
    %23 = arith.addf %20, %22 : vector<512x8xf32>
    %cst_20 = arith.constant 0.000000e+00 : f32
    %24 = vector.broadcast %cst_20 : f32 to vector<512x8xf32>
    %25 = arith.maximumf %23, %24 : vector<512x8xf32>
    %c0_21 = arith.constant 0 : index
    %c0_22 = arith.constant 0 : index
    %26 = vector.load %arg11[%c0_21, %c0_22] : memref<16x512xbf16, #tpu.memory_space<vmem>>, vector<16x512xbf16>
    %27 = arith.truncf %25 : vector<512x8xf32> to vector<512x8xbf16>
    %cst_23 = arith.constant dense<0.000000e+00> : vector<16x8xf32>
    %28 = tpu.matmul %26, %27, %cst_23 {dimension_numbers = #tpu.dot_dimension_numbers<[1], [0], [0], [1], [0, 0, 1, 1], [], []>} : vector<16x512xbf16>, vector<512x8xbf16>, vector<16x8xf32> -> vector<16x8xf32>
    %c0_24 = arith.constant 0 : index
    %c0_25 = arith.constant 0 : index
    %29 = vector.load %arg12[%c0_24, %c0_25] : memref<16x1xf32, #tpu.memory_space<vmem>>, vector<16x1xf32>
    %30 = vector.broadcast %29 : vector<16x1xf32> to vector<16x8xf32>
    %31 = arith.addf %28, %30 : vector<16x8xf32>
    %cst_26 = arith.constant 0.000000e+00 : f32
    %32 = vector.broadcast %cst_26 : f32 to vector<16x8xf32>
    %33 = arith.maximumf %31, %32 : vector<16x8xf32>
    %34 = vector.extract_strided_slice %33 {offsets = [0, 0], sizes = [8, 8], strides = [1, 1]} : vector<16x8xf32> to vector<8x8xf32>
    %35 = vector.extract_strided_slice %33 {offsets = [8, 0], sizes = [8, 8], strides = [1, 1]} : vector<16x8xf32> to vector<8x8xf32>
    %cst_27 = arith.constant dense<0xFF800000> : vector<8xf32>
    %36 = vector.multi_reduction <maximumf>, %34, %cst_27 [0] : vector<8x8xf32> to vector<8xf32>
    %37 = vector.shape_cast %36 : vector<8xf32> to vector<1x8xf32>
    %38 = vector.broadcast %37 : vector<1x8xf32> to vector<8x8xf32>
    %39 = arith.subf %34, %38 : vector<8x8xf32>
    %40 = math.exp %39 : vector<8x8xf32>
    %cst_28 = arith.constant dense<0.000000e+00> : vector<8xf32>
    %41 = vector.multi_reduction <add>, %40, %cst_28 [0] : vector<8x8xf32> to vector<8xf32>
    %42 = vector.shape_cast %41 : vector<8xf32> to vector<1x8xf32>
    %43 = tpu.reciprocal %42 {approx = true} : vector<1x8xf32> -> vector<1x8xf32>
    %44 = vector.broadcast %43 : vector<1x8xf32> to vector<8x8xf32>
    %45 = arith.mulf %40, %44 : vector<8x8xf32>
    %c0_29 = arith.constant 0 : index
    %c0_30 = arith.constant 0 : index
    %46 = vector.load %arg3[%c0_29, %c0_30] : memref<8x8xf32, #tpu.memory_space<vmem>>, vector<8x8xf32>
    %47 = arith.mulf %45, %46 : vector<8x8xf32>
    %cst_31 = arith.constant dense<0.000000e+00> : vector<8xf32>
    %48 = vector.multi_reduction <add>, %47, %cst_31 [0] : vector<8x8xf32> to vector<8xf32>
    %49 = vector.shape_cast %48 : vector<8xf32> to vector<1x8xf32>
    %50 = vector.broadcast %49 : vector<1x8xf32> to vector<8x8xf32>
    %51 = arith.divf %47, %50 : vector<8x8xf32>
    %c0_32 = arith.constant 0 : index
    %c0_33 = arith.constant 0 : index
    %52 = vector.load %arg13[%c0_32, %c0_33] : memref<16x8xf32, #tpu.memory_space<vmem>>, vector<8x8xf32>
    tpu.vector_store %arg13[%c0_32, %c0_33], %51 {strides = array<i32>} : memref<16x8xf32, #tpu.memory_space<vmem>>, vector<8x8xf32>,
    %c8 = arith.constant 8 : index
    %c0_34 = arith.constant 0 : index
    %53 = vector.load %arg13[%c8, %c0_34] : memref<16x8xf32, #tpu.memory_space<vmem>>, vector<8x8xf32>
    tpu.vector_store %arg13[%c8, %c0_34], %35 {strides = array<i32>} : memref<16x8xf32, #tpu.memory_space<vmem>>, vector<8x8xf32>,
    return
  }
  func.func @transform_0(%arg0: i32) -> (i32, i32) {
    %c0_i32 = arith.constant 0 : i32
    %c0_i32_0 = arith.constant 0 : i32
    return %c0_i32, %arg0 : i32, i32
  }
  func.func @transform_1(%arg0: i32) -> (i32, i32) {
    %c0_i32 = arith.constant 0 : i32
    %c0_i32_0 = arith.constant 0 : i32
    return %c0_i32, %arg0 : i32, i32
  }
  func.func @transform_2(%arg0: i32) -> (i32, i32) {
    %c0_i32 = arith.constant 0 : i32
    %c0_i32_0 = arith.constant 0 : i32
    return %c0_i32, %arg0 : i32, i32
  }
  func.func @transform_3(%arg0: i32) -> (i32, i32) {
    %c0_i32 = arith.constant 0 : i32
    %c0_i32_0 = arith.constant 0 : i32
    %c0_i32_1 = arith.constant 0 : i32
    return %c0_i32, %c0_i32_0 : i32, i32
  }
  func.func @transform_4(%arg0: i32) -> (i32, i32) {
    %c0_i32 = arith.constant 0 : i32
    %c0_i32_0 = arith.constant 0 : i32
    %c0_i32_1 = arith.constant 0 : i32
    return %c0_i32, %c0_i32_0 : i32, i32
  }
  func.func @transform_5(%arg0: i32) -> (i32, i32) {
    %c0_i32 = arith.constant 0 : i32
    %c0_i32_0 = arith.constant 0 : i32
    %c0_i32_1 = arith.constant 0 : i32
    return %c0_i32, %c0_i32_0 : i32, i32
  }
  func.func @transform_6(%arg0: i32) -> (i32, i32) {
    %c0_i32 = arith.constant 0 : i32
    %c0_i32_0 = arith.constant 0 : i32
    %c0_i32_1 = arith.constant 0 : i32
    return %c0_i32, %c0_i32_0 : i32, i32
  }
  func.func @transform_7(%arg0: i32) -> (i32, i32) {
    %c0_i32 = arith.constant 0 : i32
    %c0_i32_0 = arith.constant 0 : i32
    %c0_i32_1 = arith.constant 0 : i32
    return %c0_i32, %c0_i32_0 : i32, i32
  }
  func.func @transform_8(%arg0: i32) -> (i32, i32) {
    %c0_i32 = arith.constant 0 : i32
    %c0_i32_0 = arith.constant 0 : i32
    %c0_i32_1 = arith.constant 0 : i32
    return %c0_i32, %c0_i32_0 : i32, i32
  }
  func.func @transform_9(%arg0: i32) -> (i32, i32) {
    %c0_i32 = arith.constant 0 : i32
    %c0_i32_0 = arith.constant 0 : i32
    %c0_i32_1 = arith.constant 0 : i32
    return %c0_i32, %c0_i32_0 : i32, i32
  }
  func.func @transform_10(%arg0: i32) -> (i32, i32) {
    %c0_i32 = arith.constant 0 : i32
    %c0_i32_0 = arith.constant 0 : i32
    %c0_i32_1 = arith.constant 0 : i32
    return %c0_i32, %c0_i32_0 : i32, i32
  }
  func.func @transform_11(%arg0: i32) -> (i32, i32) {
    %c0_i32 = arith.constant 0 : i32
    %c0_i32_0 = arith.constant 0 : i32
    %c0_i32_1 = arith.constant 0 : i32
    return %c0_i32, %c0_i32_0 : i32, i32
  }
  func.func @transform_12(%arg0: i32) -> (i32, i32) {
    %c0_i32 = arith.constant 0 : i32
    %c0_i32_0 = arith.constant 0 : i32
    return %c0_i32, %arg0 : i32, i32
  }
}

</mosaic_0001>

<bundles_post_ra>
// kernel: eviction_policy_forward.1
= control target key start
LH: loop header
LB: loop body
LE: loop exit
PB: predicated region body
PF: predicated region fallthrough
CT: control target
= control target key end

     0   :  { %v2761_v0 = vmov 0   ;;  %vm96_vm0 = vcmask 261120   ;;  %vm2139_vm1 = vcmask 64512   ;;  %s3705_s4 = inlined_call_operand.vmem [shape: f32[32,1], index: 4, kind: input, shape index: {}]   ;;  %s3706_s0 = inlined_call_operand.vmem [shape: bf16[32,8], index: 0, kind: input, shape index: {}]   ;;  %s3707_s3 = inlined_call_operand.vmem [shape: bf16[32,32], index: 3, kind: input, shape index: {}]   ;;  %s3708_s6 = inlined_call_operand.vmem [shape: f32[32,1], index: 6, kind: input, shape index: {}]   ;;  %s3709_s9 = inlined_call_operand.vmem [shape: f32[512,1], index: 9, kind: input, shape index: {}]   ;;  %s3710_s5 = inlined_call_operand.vmem [shape: bf16[32,32], index: 5, kind: input, shape index: {}]   ;;  %s3711_s11 = inlined_call_operand.vmem [shape: f32[16,1], index: 11, kind: input, shape index: {}]   ;;  %s3712_s8 = inlined_call_operand.vmem [shape: bf16[512,32], index: 8, kind: input, shape index: {}]   ;;  %s3713_s1 = inlined_call_operand.vmem [shape: bf16[128,8], index: 1, kind: input, shape index: {}]   ;;  %s3714_s7 = inlined_call_operand.vmem [shape: bf16[512,128], index: 7, kind: input, shape index: {}]   ;;  %s3715_s10 = inlined_call_operand.vmem [shape: bf16[16,512], index: 10, kind: input, shape index: {}]   ;;  %s3716_s12 = inlined_call_operand.vmem [shape: f32[16,8], index: 12, kind: output, shape index: {}]   ;;  %s3717_s2 = inlined_call_operand.vmem [shape: f32[8,8], index: 2, kind: input, shape index: {}]  }
   0x1   :  { %2654 = vset.pattern.permute.xlu1 %v2761_v0  ;;  %2653 = vset.pattern.permute.xlu0 %v2761_v0  ;;  %v52_v1 = vld [vmem:[%s3705_s4 + $0x10] sm:$0xff]  ;;  %v50_v2 = vld [vmem:[%s3705_s4] sm:$0xff]  ;;  %v53_v4 = vld [vmem:[%s3705_s4 + $0x18] sm:$0xff] }
   0x2   :  { %66 = vperm.xlu1 %2654, %v52_v1   ;;  %56 = vperm.xlu0 %2653, %v50_v2   ;;  %v2655_v3 = vld [vmem:[%s3706_s0] sm:$0xff]   ;;  %v51_v5 = vld [vmem:[%s3705_s4 + $0x8] sm:$0xff]  ;;  %v165_v11 = vld [vmem:[%s3708_s6 + $0x18] sm:$0xff] }
   0x3   :  { %2420 = vmatprep.subr.bf16.mxu1 %v2655_v3  ;;  %v2656_v6 = vld [vmem:[%s3706_s0 + $0x8] sm:$0xff]   ;;  %v2657_v7 = vld [vmem:[%s3707_s3] sm:$0xff]   ;;  %v164_v12 = vld [vmem:[%s3708_s6 + $0x10] sm:$0xff] }
   0x4   :  { %2421 = vmatpush3.bf16.msra.mxu1 %v2655_v3  ;;  %v163_v8 = vld [vmem:[%s3708_s6 + $0x8] sm:$0xff]  ;;  %v162_v9 = vld [vmem:[%s3708_s6] sm:$0xff]  ;;  %2424 = vmatprep.mubr.msk.bf16.mxu1 %vm96_vm0, %v2657_v7  ;;  %v1494_v17 = vld [vmem:[%s3709_s9 + $0x98] sm:$0xff] }
   0x5   :  { %2422 = vmatprep.subr.bf16.mxu1 %v2656_v6  ;;  %v2658_v10 = vld [vmem:[%s3707_s3 + $0x8] sm:$0xff]   ;;  %v1491_v14 = vld [vmem:[%s3709_s9 + $0x80] sm:$0xff]  ;;  %v1493_v18 = vld [vmem:[%s3709_s9 + $0x90] sm:$0xff] }
   0x6   :  { %71 = vperm.xlu1 %2654, %v53_v4   ;;  %61 = vperm.xlu0 %2653, %v51_v5   ;;  %v1492_v13 = vld [vmem:[%s3709_s9 + $0x88] sm:$0xff]  ;;  %v1475_v16 = vld [vmem:[%s3709_s9] sm:$0xff]  ;;  %v1478_v19 = vld [vmem:[%s3709_s9 + $0x18] sm:$0xff] }
   0x7   :  { %v1476_v15 = vld [vmem:[%s3709_s9 + $0x8] sm:$0xff]  ;;  %v1477_v20 = vld [vmem:[%s3709_s9 + $0x10] sm:$0xff]  ;;  %v1495_v22 = vld [vmem:[%s3709_s9 + $0xa0] sm:$0xff] }
   0x8   :  { %2423 = vmatpush3.bf16.msra.mxu1 %v2656_v6  ;;  %v1496_v21 = vld [vmem:[%s3709_s9 + $0xa8] sm:$0xff]  ;;  %v1479_v24 = vld [vmem:[%s3709_s9 + $0x20] sm:$0xff]  ;;  %v1498_v25 = vld [vmem:[%s3709_s9 + $0xb8] sm:$0xff] }
   0x9   :  { %v1480_v23 = vld [vmem:[%s3709_s9 + $0x28] sm:$0xff]  ;;  %v1497_v26 = vld [vmem:[%s3709_s9 + $0xb0] sm:$0xff]  ;;  %v1482_v27 = vld [vmem:[%s3709_s9 + $0x38] sm:$0xff] }
   0xa   :  { %173 = vperm.xlu1 %2654, %v163_v8   ;;  %168 = vperm.xlu0 %2653, %v162_v9   ;;  %v1481_v28 = vld [vmem:[%s3709_s9 + $0x30] sm:$0xff]  ;;  %v1500_v29 = vld [vmem:[%s3709_s9 + $0xc8] sm:$0xff]  ;;  %v1499_v30 = vld [vmem:[%s3709_s9 + $0xc0] sm:$0xff] }
   0xb   :  { %2425 = vmatmul.mubr.msk.bf16.vlgmr.msra.gmra.mrb[0].mxu1 %vm96_vm0, %v2658_v10  ;;  %v1484_v31 = vld [vmem:[%s3709_s9 + $0x48] sm:$0xff]  ;;  %v1483_v32 = vld [vmem:[%s3709_s9 + $0x40] sm:$0xff]  ;;  %v1502_v33 = vld [vmem:[%s3709_s9 + $0xd8] sm:$0xff] }
   0xc   :  { %v1501_v34 = vld [vmem:[%s3709_s9 + $0xd0] sm:$0xff]  ;;  %v1486_v35 = vld [vmem:[%s3709_s9 + $0x58] sm:$0xff]  ;;  %v1504_v37 = vld [vmem:[%s3709_s9 + $0xe8] sm:$0xff] }
   0xd   :  { %v1485_v36 = vld [vmem:[%s3709_s9 + $0x50] sm:$0xff]  ;;  %v1503_v38 = vld [vmem:[%s3709_s9 + $0xe0] sm:$0xff]  ;;  %v1488_v39 = vld [vmem:[%s3709_s9 + $0x68] sm:$0xff] }
   0xe   :  { %183 = vperm.xlu1 %2654, %v165_v11   ;;  %178 = vperm.xlu0 %2653, %v164_v12   ;;  %v1487_v40 = vld [vmem:[%s3709_s9 + $0x60] sm:$0xff]  ;;  %v1506_v41 = vld [vmem:[%s3709_s9 + $0xf8] sm:$0xff]  ;;  %v1505_v42 = vld [vmem:[%s3709_s9 + $0xf0] sm:$0xff] }
   0xf   :  { %v1490_v43 = vld [vmem:[%s3709_s9 + $0x78] sm:$0xff]  ;;  %v1489_v44 = vld [vmem:[%s3709_s9 + $0x70] sm:$0xff]  ;;  %v1524_v45 = vld [vmem:[%s3709_s9 + $0x188] sm:$0xff] }
  0x10   :  { %v1523_v46 = vld [vmem:[%s3709_s9 + $0x180] sm:$0xff]  ;;  %v1508_v47 = vld [vmem:[%s3709_s9 + $0x108] sm:$0xff]  ;;  %v1526_v49 = vld [vmem:[%s3709_s9 + $0x198] sm:$0xff] }
  0x11   :  { %v1507_v48 = vld [vmem:[%s3709_s9 + $0x100] sm:$0xff]  ;;  %v1525_v50 = vld [vmem:[%s3709_s9 + $0x190] sm:$0xff]  ;;  %v1510_v51 = vld [vmem:[%s3709_s9 + $0x118] sm:$0xff] }
  0x12   :  { %1626 = vperm.xlu1 %2654, %v1492_v13   ;;  %1621 = vperm.xlu0 %2653, %v1491_v14   ;;  %v1509_v52 = vld [vmem:[%s3709_s9 + $0x110] sm:$0xff]  ;;  %v1528_v53 = vld [vmem:[%s3709_s9 + $0x1a8] sm:$0xff]  ;;  %v1527_v54 = vld [vmem:[%s3709_s9 + $0x1a0] sm:$0xff] }
  0x13   :  { %v1512_v55 = vld [vmem:[%s3709_s9 + $0x128] sm:$0xff]  ;;  %v1511_v56 = vld [vmem:[%s3709_s9 + $0x120] sm:$0xff]  ;;  %v1530_v57 = vld [vmem:[%s3709_s9 + $0x1b8] sm:$0xff] }
  0x14   :  { %v1529_v58 = vld [vmem:[%s3709_s9 + $0x1b0] sm:$0xff]  ;;  %v1514_v59 = vld [vmem:[%s3709_s9 + $0x138] sm:$0xff]  ;;  %v1532_v61 = vld [vmem:[%s3709_s9 + $0x1c8] sm:$0xff] }
  0x15   :  { %v1513_v60 = vld [vmem:[%s3709_s9 + $0x130] sm:$0xff]  ;;  %v1531_v62 = vld [vmem:[%s3709_s9 + $0x1c0] sm:$0xff]  ;;  %v1516_v63 = vld [vmem:[%s3709_s9 + $0x148] sm:$0xff] }
  0x16   :  { %1546 = vperm.xlu1 %2654, %v1476_v15   ;;  %1541 = vperm.xlu0 %2653, %v1475_v16   ;;  %v1515_v0 = vld [vmem:[%s3709_s9 + $0x140] sm:$0xff]  ;;  %v1534_v1 = vld [vmem:[%s3709_s9 + $0x1d8] sm:$0xff]  ;;  %v1533_v2 = vld [vmem:[%s3709_s9 + $0x1d0] sm:$0xff] }
  0x17   :  { %v2659_v3 = vld [vmem:[%s3710_s5] sm:$0xff]   ;;  %v1518_v4 = vld [vmem:[%s3709_s9 + $0x158] sm:$0xff]  ;;  %v1517_v5 = vld [vmem:[%s3709_s9 + $0x150] sm:$0xff] }
  0x18   :  { %2432 = vmatprep.mubr.msk.bf16.mxu1 %vm96_vm0, %v2659_v3  ;;  %v1536_v6 = vld [vmem:[%s3709_s9 + $0x1e8] sm:$0xff]  ;;  %v1535_v7 = vld [vmem:[%s3709_s9 + $0x1e0] sm:$0xff]  ;;  %v1538_v10 = vld [vmem:[%s3709_s9 + $0x1f8] sm:$0xff] }
  0x19   :  { %v1520_v8 = vld [vmem:[%s3709_s9 + $0x168] sm:$0xff]  ;;  %v1519_v9 = vld [vmem:[%s3709_s9 + $0x160] sm:$0xff]  ;;  %v1537_v11 = vld [vmem:[%s3709_s9 + $0x1f0] sm:$0xff] }
  0x1a   :  { %1636 = vperm.xlu1 %2654, %v1494_v17   ;;  %1631 = vperm.xlu0 %2653, %v1493_v18   ;;  %v1522_v12 = vld [vmem:[%s3709_s9 + $0x178] sm:$0xff]  ;;  %v1521_v13 = vld [vmem:[%s3709_s9 + $0x170] sm:$0xff]  ;;  %v2024_v14 = vld [vmem:[%s3711_s11 + $0x8] sm:$0xff] }
  0x1b   :  { %v2023_v15 = vld [vmem:[%s3711_s11] sm:$0xff] }
  0x1c   :  { %v2671_v3 = vld [vmem:[%s3713_s1 + $0x20] sm:$0xff]  }
  0x1e   :  { %1556 = vperm.xlu1 %2654, %v1478_v19   ;;  %1551 = vperm.xlu0 %2653, %v1477_v20  }
  0x22   :  { %1646 = vperm.xlu1 %2654, %v1496_v21   ;;  %1641 = vperm.xlu0 %2653, %v1495_v22  }
  0x26   :  { %1566 = vperm.xlu1 %2654, %v1480_v23   ;;  %1561 = vperm.xlu0 %2653, %v1479_v24  }
  0x2a   :  { %1656 = vperm.xlu1 %2654, %v1498_v25   ;;  %1651 = vperm.xlu0 %2653, %v1497_v26  }
  0x2e   :  { %1576 = vperm.xlu1 %2654, %v1482_v27   ;;  %1571 = vperm.xlu0 %2653, %v1481_v28  }
  0x32   :  { %1666 = vperm.xlu1 %2654, %v1500_v29   ;;  %1661 = vperm.xlu0 %2653, %v1499_v30  }
  0x36   :  { %1586 = vperm.xlu1 %2654, %v1484_v31   ;;  %1581 = vperm.xlu0 %2653, %v1483_v32  }
  0x3a   :  { %1676 = vperm.xlu1 %2654, %v1502_v33   ;;  %1671 = vperm.xlu0 %2653, %v1501_v34   ;;  %v2660_v34 = vld [vmem:[%s3710_s5 + $0x8] sm:$0xff]  }
  0x3e   :  { %1596 = vperm.xlu1 %2654, %v1486_v35   ;;  %1591 = vperm.xlu0 %2653, %v1485_v36   ;;  %v2661_v35 = vld [vmem:[%s3712_s8] sm:$0xff]  }
  0x3f   :  { %2440 = vmatprep.mubr.msk.bf16.mxu0 %vm96_vm0, %v2661_v35  ;;  %v2685_v36 = vld [vmem:[%s3712_s8 + $0x40] sm:$0xff]   ;;  %v2692_v35 = vld [vmem:[%s3714_s7 + $0x58] sm:$0xff]  }
  0x42   :  { %1686 = vperm.xlu1 %2654, %v1504_v37   ;;  %1681 = vperm.xlu0 %2653, %v1503_v38  }
  0x46   :  { %1606 = vperm.xlu1 %2654, %v1488_v39   ;;  %1601 = vperm.xlu0 %2653, %v1487_v40  }
  0x4a   :  { %1696 = vperm.xlu1 %2654, %v1506_v41   ;;  %1691 = vperm.xlu0 %2653, %v1505_v42  }
  0x4e   :  { %1616 = vperm.xlu1 %2654, %v1490_v43   ;;  %1611 = vperm.xlu0 %2653, %v1489_v44  }
  0x52   :  { %1786 = vperm.xlu1 %2654, %v1524_v45   ;;  %1781 = vperm.xlu0 %2653, %v1523_v46  }
  0x56   :  { %1706 = vperm.xlu1 %2654, %v1508_v47   ;;  %1701 = vperm.xlu0 %2653, %v1507_v48  }
  0x5a   :  { %1796 = vperm.xlu1 %2654, %v1526_v49   ;;  %1791 = vperm.xlu0 %2653, %v1525_v50  }
  0x5e   :  { %1716 = vperm.xlu1 %2654, %v1510_v51   ;;  %1711 = vperm.xlu0 %2653, %v1509_v52  }
  0x62   :  { %1806 = vperm.xlu1 %2654, %v1528_v53   ;;  %1801 = vperm.xlu0 %2653, %v1527_v54  }
  0x66   :  { %1726 = vperm.xlu1 %2654, %v1512_v55   ;;  %1721 = vperm.xlu0 %2653, %v1511_v56   ;;  %v2663_v55 = vld [vmem:[%s3713_s1] sm:$0xff]   ;;  %v2662_v56 = vld [vmem:[%s3712_s8 + $0x8] sm:$0xff]  }
  0x6a   :  { %1816 = vperm.xlu1 %2654, %v1530_v57   ;;  %1811 = vperm.xlu0 %2653, %v1529_v58   ;;  %v2686_v57 = vld [vmem:[%s3712_s8 + $0x48] sm:$0xff]   ;;  %v2665_v58 = vld [vmem:[%s3712_s8 + $0x10] sm:$0xff]  }
  0x6e   :  { %1736 = vperm.xlu1 %2654, %v1514_v59   ;;  %1731 = vperm.xlu0 %2653, %v1513_v60   ;;  %v2664_v59 = vld [vmem:[%s3713_s1 + $0x8] sm:$0xff]   ;;  %v2689_v60 = vld [vmem:[%s3712_s8 + $0x50] sm:$0xff]  }
  0x72   :  { %1826 = vperm.xlu1 %2654, %v1532_v61   ;;  %1821 = vperm.xlu0 %2653, %v1531_v62   ;;  %v2667_v61 = vld [vmem:[%s3713_s1 + $0x10] sm:$0xff]   ;;  %v2666_v62 = vld [vmem:[%s3712_s8 + $0x18] sm:$0xff]  }
  0x76   :  { %1746 = vperm.xlu1 %2654, %v1516_v63   ;;  %1741 = vperm.xlu0 %2653, %v1515_v0   ;;  %v2691_v63 = vld [vmem:[%s3712_s8 + $0x58] sm:$0xff]   ;;  %v2669_v0 = vld [vmem:[%s3712_s8 + $0x20] sm:$0xff]  }
  0x7a   :  { %1836 = vperm.xlu1 %2654, %v1534_v1   ;;  %1831 = vperm.xlu0 %2653, %v1533_v2   ;;  %v2668_v1 = vld [vmem:[%s3713_s1 + $0x18] sm:$0xff]   ;;  %v2693_v2 = vld [vmem:[%s3712_s8 + $0x60] sm:$0xff]  }
  0x7e   :  { %1756 = vperm.xlu1 %2654, %v1518_v4   ;;  %1751 = vperm.xlu0 %2653, %v1517_v5   ;;  %v2670_v4 = vld [vmem:[%s3712_s8 + $0x28] sm:$0xff]  }
  0x7f   :  { %v2695_v5 = vld [vmem:[%s3712_s8 + $0x68] sm:$0xff]  }
  0x81   :  { %v67_v16 = vpop.permute.xlu1 %66  ;;  %v57_v17 = vpop.permute.xlu0 %56 }
  0x82   :  { %1846 = vperm.xlu1 %2654, %v1536_v6   ;;  %1841 = vperm.xlu0 %2653, %v1535_v7   ;;  %v2673_v6 = vld [vmem:[%s3712_s8 + $0x30] sm:$0xff]   ;;  %v2672_v7 = vld [vmem:[%s3713_s1 + $0x28] sm:$0xff]  }
  0x85   :  { %v72_v22 = vpop.permute.xlu1 %71  ;;  %v62_v24 = vpop.permute.xlu0 %61 }
  0x86   :  { %1766 = vperm.xlu1 %2654, %v1520_v8   ;;  %1761 = vperm.xlu0 %2653, %v1519_v9   ;;  %v2697_v8 = vld [vmem:[%s3712_s8 + $0x70] sm:$0xff]  }
  0x87   :  { %v2675_v9 = vld [vmem:[%s3713_s1 + $0x30] sm:$0xff]  }
  0x89   :  { %v169_v37 = vpop.permute.xlu0 %168  ;;  %v174_v38 = vpop.permute.xlu1 %173 }
  0x8a   :  { %1856 = vperm.xlu1 %2654, %v1538_v10   ;;  %1851 = vperm.xlu0 %2653, %v1537_v11   ;;  %v2674_v10 = vld [vmem:[%s3712_s8 + $0x38] sm:$0xff]  }
  0x8b   :  { %v2699_v11 = vld [vmem:[%s3712_s8 + $0x78] sm:$0xff]  }
  0x8d   :  { %v179_v39 = vpop.permute.xlu0 %178  ;;  %v184_v43 = vpop.permute.xlu1 %183 }
  0x8e   :  { %1776 = vperm.xlu1 %2654, %v1522_v12   ;;  %1771 = vperm.xlu0 %2653, %v1521_v13   ;;  %v2677_v12 = vld [vmem:[%s3714_s7] sm:$0xff]   ;;  %v2676_v13 = vld [vmem:[%s3713_s1 + $0x38] sm:$0xff]  }
  0x92   :  { %2032 = vperm.xlu1 %2654, %v2024_v14   ;;  %2027 = vperm.xlu0 %2653, %v2023_v15   ;;  %v2701_v14 = vld [vmem:[%s3712_s8 + $0x80] sm:$0xff]   ;;  %v2678_v15 = vld [vmem:[%s3714_s7 + $0x8] sm:$0xff]  }
  0xde   :  { %v2426_v18 = vpop.f32.mrb[0].mxu1 }
  0xdf   :  { %v146_v19 = vadd.f32 %v2426_v18, %v67_v16  ;;  %v137_v20 = vpop.f32.mrb[1].mxu1  ;;  %v2703_v16 = vld [vmem:[%s3712_s8 + $0x88] sm:$0xff]   ;;  %v2705_v18 = vld [vmem:[%s3712_s8 + $0x90] sm:$0xff]  }
  0xe0   :  { %v138_v21 = vadd.f32 %v137_v20, %v57_v17  ;;  %v2427_v23 = vpop.f32.mrb[2].mxu1  ;;  %v2679_v17 = vld [vmem:[%s3714_s7 + $0x10] sm:$0xff]   ;;  %v2707_v20 = vld [vmem:[%s3712_s8 + $0x98] sm:$0xff]  }
  0xe1   :  { %2739 = vtanh.f32 %v146_v19  ;;  %v149_v25 = vadd.f32 %v2427_v23, %v72_v22  ;;  %v140_v26 = vpop.f32.mrb[3].mxu1  ;;  %v2680_v19 = vld [vmem:[%s3714_s7 + $0x18] sm:$0xff]   ;;  %v2709_v22 = vld [vmem:[%s3712_s8 + $0xa0] sm:$0xff]   ;;  %v2682_v23 = vld [vmem:[%s3714_s7 + $0x28] sm:$0xff]  }
  0xe2   :  { %2741 = vtanh.f32 %v138_v21  ;;  %v141_v27 = vadd.f32 %v140_v26, %v62_v24  ;;  %v2681_v21 = vld [vmem:[%s3714_s7 + $0x20] sm:$0xff]   ;;  %v2711_v24 = vld [vmem:[%s3712_s8 + $0xa8] sm:$0xff]   ;;  %v2713_v26 = vld [vmem:[%s3712_s8 + $0xb0] sm:$0xff]  }
  0xe3   :  { %2743 = vtanh.f32 %v149_v25  ;;  %v2683_v25 = vld [vmem:[%s3714_s7 + $0x30] sm:$0xff]  }
  0xe4   :  { %2745 = vtanh.f32 %v141_v27  ;;  %v2684_v27 = vld [vmem:[%s3714_s7 + $0x38] sm:$0xff]  }
  0xeb   :  { %v2740_v28 = vpop.eup %2739 }
  0xec   :  { %v2742_v29 = vpop.eup %2741 }
  0xed   :  { %v2744_v30 = vpop.eup %2743 }
  0xee   :  { %v2746_v31 = vpop.eup %2745  ;;  %v161_v32 = vpack.c.bf16 %v2744_v30, %v2740_v28  ;;  %v2715_v28 = vld [vmem:[%s3712_s8 + $0xb8] sm:$0xff]   ;;  %v2717_v30 = vld [vmem:[%s3712_s8 + $0xc0] sm:$0xff]  }
  0xef   :  { %v160_v33 = vpack.c.bf16 %v2746_v31, %v2742_v29  ;;  %v2687_v29 = vld [vmem:[%s3714_s7 + $0x40] sm:$0xff]   ;;  %v2688_v31 = vld [vmem:[%s3714_s7 + $0x48] sm:$0xff]  }
  0xf1   :  { %2428 = vmatprep.subr.bf16.mxu1 %v160_v33 }
  0xf2   :  { %2429 = vmatpush3.bf16.msra.mxu1 %v160_v33  ;;  %v2690_v33 = vld [vmem:[%s3714_s7 + $0x50] sm:$0xff]  }
  0xf3   :  { %2430 = vmatprep.subr.bf16.mxu1 %v161_v32 }
  0xf6   :  { %2431 = vmatpush3.bf16.msra.mxu1 %v161_v32  ;;  %v2719_v32 = vld [vmem:[%s3712_s8 + $0xc8] sm:$0xff]  }
  0xf9   :  { %2433 = vmatmul.mubr.msk.bf16.vlgmr.msra.gmra.mrb[4].mxu1 %vm96_vm0, %v2660_v34  ;;  %v2721_v34 = vld [vmem:[%s3712_s8 + $0xd0] sm:$0xff]  }
  0xfa   :  { %2456 = vmatprep.mubr.msk.bf16.mxu1 %vm96_vm0, %v2685_v36  ;;  %v2723_v36 = vld [vmem:[%s3712_s8 + $0xd8] sm:$0xff]  }
 0x1cc   :  { %v2434_v40 = vpop.f32.mrb[4].mxu1 }
 0x1cd   :  { %v245_v41 = vadd.f32 %v2434_v40, %v179_v39  ;;  %v236_v42 = vpop.f32.mrb[5].mxu1  ;;  %v2696_v39 = vld [vmem:[%s3714_s7 + $0x68] sm:$0xff]  }
 0x1ce   :  { %v237_v44 = vadd.f32 %v236_v42, %v169_v37  ;;  %v2435_v45 = vpop.f32.mrb[6].mxu1  ;;  %v2694_v37 = vld [vmem:[%s3714_s7 + $0x60] sm:$0xff]   ;;  %v2727_v40 = vld [vmem:[%s3712_s8 + $0xe8] sm:$0xff]   ;;  %v2729_v42 = vld [vmem:[%s3712_s8 + $0xf0] sm:$0xff]  }
 0x1cf   :  { %2747 = vtanh.f32 %v245_v41  ;;  %v248_v46 = vadd.f32 %v2435_v45, %v184_v43  ;;  %v239_v47 = vpop.f32.mrb[7].mxu1  ;;  %v2698_v41 = vld [vmem:[%s3714_s7 + $0x70] sm:$0xff]   ;;  %v2700_v43 = vld [vmem:[%s3714_s7 + $0x78] sm:$0xff]   ;;  %v2702_v45 = vld [vmem:[%s3714_s7 + $0x80] sm:$0xff]  }
 0x1d0   :  { %2749 = vtanh.f32 %v237_v44  ;;  %v240_v48 = vadd.f32 %v239_v47, %v174_v38  ;;  %v2725_v38 = vld [vmem:[%s3712_s8 + $0xe0] sm:$0xff]   ;;  %v2731_v44 = vld [vmem:[%s3712_s8 + $0xf8] sm:$0xff]   ;;  %v2706_v47 = vld [vmem:[%s3714_s7 + $0x90] sm:$0xff]  }
 0x1d1   :  { %2751 = vtanh.f32 %v248_v46  ;;  %v2704_v46 = vld [vmem:[%s3714_s7 + $0x88] sm:$0xff]  }
 0x1d2   :  { %2753 = vtanh.f32 %v240_v48  ;;  %v2708_v48 = vld [vmem:[%s3714_s7 + $0x98] sm:$0xff]  }
 0x1d9   :  { %v2748_v49 = vpop.eup %2747 }
 0x1da   :  { %v2750_v50 = vpop.eup %2749 }
 0x1db   :  { %v2752_v51 = vpop.eup %2751 }
 0x1dc   :  { %v2754_v52 = vpop.eup %2753  ;;  %v400_v53 = vpack.c.bf16 %v2752_v51, %v2748_v49  ;;  %v2710_v49 = vld [vmem:[%s3714_s7 + $0xa0] sm:$0xff]   ;;  %v2714_v51 = vld [vmem:[%s3714_s7 + $0xb0] sm:$0xff]  }
 0x1dd   :  { %v399_v54 = vpack.c.bf16 %v2754_v52, %v2750_v50  ;;  %v2712_v50 = vld [vmem:[%s3714_s7 + $0xa8] sm:$0xff]   ;;  %v2716_v52 = vld [vmem:[%s3714_s7 + $0xb8] sm:$0xff]  }
 0x1df   :  { %2436 = vmatprep.subr.bf16.mxu0 %v399_v54  ;;  %2584 = vmatprep.subr.bf16.mxu1 %v399_v54 }
 0x1e0   :  { %2437 = vmatpush3.bf16.msra.mxu0 %v399_v54  ;;  %2586 = vmatpush3.bf16.msra.mxu1 %v399_v54  ;;  %v2720_v54 = vld [vmem:[%s3714_s7 + $0xc8] sm:$0xff]  }
 0x1e1   :  { %2438 = vmatprep.subr.bf16.mxu0 %v400_v53  ;;  %2585 = vmatprep.subr.bf16.mxu1 %v400_v53 }
 0x1e4   :  { %2439 = vmatpush3.bf16.msra.mxu0 %v400_v53  ;;  %2587 = vmatpush3.bf16.msra.mxu1 %v400_v53  ;;  %v2718_v53 = vld [vmem:[%s3714_s7 + $0xc0] sm:$0xff]  }
 0x1e5   :  { %2504 = vmatprep.subr.bf16.mxu0 %v2663_v55 }
 0x1e7   :  { %2441 = vmatmul.mubr.msk.bf16.vlgmr.msra.gmra.mrb[0].mxu0 %vm96_vm0, %v2662_v56  ;;  %2457 = vmatmul.mubr.msk.bf16.vlgmr.msra.gmra.mrb[8].mxu1 %vm96_vm0, %v2686_v57  ;;  %v2724_v56 = vld [vmem:[%s3714_s7 + $0xd8] sm:$0xff]   ;;  %v3307_v57 = vpop.permute.xlu1 %1626 }
 0x1e8   :  { %2505 = vmatpush3.bf16.msra.mxu0 %v2663_v55  ;;  %2444 = vmatprep.mubr.msk.bf16.mxu0 %vm96_vm0, %v2665_v58  ;;  %v2722_v55 = vld [vmem:[%s3714_s7 + $0xd0] sm:$0xff]   ;;  %v2726_v58 = vld [vmem:[%s3714_s7 + $0xe0] sm:$0xff]  }
 0x1e9   :  { %2506 = vmatprep.subr.bf16.mxu0 %v2664_v59  ;;  %2460 = vmatprep.mubr.msk.bf16.mxu1 %vm96_vm0, %v2689_v60 }
 0x1eb   :  { %v3314_v60 = vpop.permute.xlu1 %1546 }
 0x1ec   :  { %2507 = vmatpush3.bf16.msra.mxu0 %v2664_v59  ;;  %v3312_v59 = vpop.permute.xlu0 %1621 }
 0x1ed   :  { %2508 = vmatprep.subr.bf16.mxu0 %v2667_v61 }
 0x1ef   :  { %2445 = vmatmul.mubr.msk.bf16.gmra.mrb[4].mxu0 %vm96_vm0, %v2666_v62  ;;  %2461 = vmatmul.mubr.msk.bf16.gmra.mrb[12].mxu1 %vm96_vm0, %v2691_v63  ;;  %v2728_v62 = vld [vmem:[%s3714_s7 + $0xe8] sm:$0xff]   ;;  %v2730_v63 = vld [vmem:[%s3714_s7 + $0xf0] sm:$0xff]  }
 0x1f0   :  { %2509 = vmatpush3.bf16.msra.mxu0 %v2667_v61  ;;  %2448 = vmatprep.mubr.msk.bf16.mxu0 %vm96_vm0, %v2669_v0  ;;  %v3316_v61 = vpop.permute.xlu0 %1541  ;;  %v3324_v0 = vpop.permute.xlu1 %1636 }
 0x1f1   :  { %2510 = vmatprep.subr.bf16.mxu0 %v2668_v1  ;;  %2464 = vmatprep.mubr.msk.bf16.mxu1 %vm96_vm0, %v2693_v2  ;;  %v2732_v2 = vld [vmem:[%s3714_s7 + $0xf8] sm:$0xff]  }
 0x1f4   :  { %2511 = vmatpush3.bf16.msra.mxu0 %v2668_v1  ;;  %v3326_v1 = vpop.permute.xlu0 %1631 }
 0x1f5   :  { %2512 = vmatprep.subr.bf16.mxu0 %v2671_v3 }
 0x1f7   :  { %2449 = vmatmul.mubr.msk.bf16.gmra.mrb[8].mxu0 %vm96_vm0, %v2670_v4  ;;  %2465 = vmatmul.mubr.msk.bf16.gmra.mrb[16].mxu1 %vm96_vm0, %v2695_v5 }
 0x1f8   :  { %2513 = vmatpush3.bf16.msra.mxu0 %v2671_v3  ;;  %2452 = vmatprep.mubr.msk.bf16.mxu0 %vm96_vm0, %v2673_v6  ;;  %v1557_v3 = vpop.permute.xlu1 %1556  ;;  %v1552_v4 = vpop.permute.xlu0 %1551 }
 0x1f9   :  { %2514 = vmatprep.subr.bf16.mxu0 %v2672_v7  ;;  %2468 = vmatprep.mubr.msk.bf16.mxu1 %vm96_vm0, %v2697_v8 }
 0x1fc   :  { %2515 = vmatpush3.bf16.msra.mxu0 %v2672_v7  ;;  %v3331_v5 = vpop.permute.xlu1 %1646  ;;  %v3333_v6 = vpop.permute.xlu0 %1641 }
 0x1fd   :  { %2516 = vmatprep.subr.bf16.mxu0 %v2675_v9 }
 0x1ff   :  { %2453 = vmatmul.mubr.msk.bf16.gmra.mrb[12].mxu0 %vm96_vm0, %v2674_v10  ;;  %2469 = vmatmul.mubr.msk.bf16.gmra.mrb[20].mxu1 %vm96_vm0, %v2699_v11 }
 0x200   :  { %2517 = vmatpush3.bf16.msra.mxu0 %v2675_v9  ;;  %2520 = vmatprep.mubr.bf16.mxu0 %v2677_v12  ;;  %v3335_v7 = vpop.permute.xlu1 %1566  ;;  %v3337_v8 = vpop.permute.xlu0 %1561 }
 0x201   :  { %2518 = vmatprep.subr.bf16.mxu0 %v2676_v13  ;;  %2472 = vmatprep.mubr.msk.bf16.mxu1 %vm96_vm0, %v2701_v14 }
 0x204   :  { %2519 = vmatpush3.bf16.msra.mxu0 %v2676_v13  ;;  %v3339_v9 = vpop.permute.xlu1 %1656  ;;  %v3341_v10 = vpop.permute.xlu0 %1651 }
 0x207   :  { %2521 = vmatmul.mubr.bf16.vlgmr.msra.gmra.mrb[0].mxu0 %v2678_v15  ;;  %2473 = vmatmul.mubr.msk.bf16.gmra.mrb[24].mxu1 %vm96_vm0, %v2703_v16 }
 0x208   :  { %2524 = vmatprep.mubr.bf16.mxu0 %v2679_v17  ;;  %2476 = vmatprep.mubr.msk.bf16.mxu1 %vm96_vm0, %v2705_v18  ;;  %v3343_v11 = vpop.permute.xlu1 %1576  ;;  %v3345_v12 = vpop.permute.xlu0 %1571  ;;  %v2735_v17 = vld [vmem:[%s3715_s10 + $0x4] ss:$16 sps:$4 sm:$0xff]  }
 0x20c   :  { %v3347_v13 = vpop.permute.xlu1 %1666  ;;  %v3349_v14 = vpop.permute.xlu0 %1661 }
 0x20f   :  { %2525 = vmatmul.mubr.bf16.gmra.mrb[4].mxu0 %v2680_v19  ;;  %2477 = vmatmul.mubr.msk.bf16.gmra.mrb[28].mxu1 %vm96_vm0, %v2707_v20 }
 0x210   :  { %2528 = vmatprep.mubr.bf16.mxu0 %v2681_v21  ;;  %2480 = vmatprep.mubr.msk.bf16.mxu1 %vm96_vm0, %v2709_v22  ;;  %v3351_v15 = vpop.permute.xlu1 %1586  ;;  %v3353_v16 = vpop.permute.xlu0 %1581 }
 0x214   :  { %v3358_v18 = vpop.permute.xlu1 %1676  ;;  %v3360_v19 = vpop.permute.xlu0 %1671 }
 0x217   :  { %2529 = vmatmul.mubr.bf16.gmra.mrb[8].mxu0 %v2682_v23  ;;  %2481 = vmatmul.mubr.msk.bf16.gmra.mrb[32].mxu1 %vm96_vm0, %v2711_v24 }
 0x218   :  { %2532 = vmatprep.mubr.bf16.mxu0 %v2683_v25  ;;  %2484 = vmatprep.mubr.msk.bf16.mxu1 %vm96_vm0, %v2713_v26  ;;  %v3362_v20 = vpop.permute.xlu1 %1596  ;;  %v3364_v21 = vpop.permute.xlu0 %1591 }
 0x21c   :  { %v3366_v22 = vpop.permute.xlu1 %1686  ;;  %v3368_v23 = vpop.permute.xlu0 %1681 }
 0x21f   :  { %2533 = vmatmul.mubr.bf16.gmra.mrb[12].mxu0 %v2684_v27  ;;  %2485 = vmatmul.mubr.msk.bf16.gmra.mrb[36].mxu1 %vm96_vm0, %v2715_v28 }
 0x220   :  { %2536 = vmatprep.mubr.bf16.mxu0 %v2687_v29  ;;  %2488 = vmatprep.mubr.msk.bf16.mxu1 %vm96_vm0, %v2717_v30  ;;  %v3370_v24 = vpop.permute.xlu1 %1606  ;;  %v3374_v26 = vpop.permute.xlu0 %1601 }
 0x224   :  { %v3382_v30 = vpop.permute.xlu1 %1696 }
 0x227   :  { %2537 = vmatmul.mubr.bf16.gmra.mrb[16].mxu0 %v2688_v31  ;;  %2489 = vmatmul.mubr.msk.bf16.gmra.mrb[40].mxu1 %vm96_vm0, %v2719_v32  ;;  %v3384_v31 = vpop.permute.xlu0 %1691 }
 0x228   :  { %2540 = vmatprep.mubr.bf16.mxu0 %v2690_v33  ;;  %2492 = vmatprep.mubr.msk.bf16.mxu1 %vm96_vm0, %v2721_v34 }
 0x22f   :  { %2541 = vmatmul.mubr.bf16.gmra.mrb[20].mxu0 %v2692_v35  ;;  %2493 = vmatmul.mubr.msk.bf16.gmra.mrb[44].mxu1 %vm96_vm0, %v2723_v36  ;;  %v3394_v36 = vpop.permute.xlu1 %1616 }
 0x230   :  { %2544 = vmatprep.mubr.bf16.mxu0 %v2694_v37  ;;  %2496 = vmatprep.mubr.msk.bf16.mxu1 %vm96_vm0, %v2725_v38  ;;  %v3396_v37 = vpop.permute.xlu0 %1611 }
 0x237   :  { %2545 = vmatmul.mubr.bf16.gmra.mrb[24].mxu0 %v2696_v39  ;;  %2497 = vmatmul.mubr.msk.bf16.gmra.mrb[48].mxu1 %vm96_vm0, %v2727_v40  ;;  %v3402_v40 = vpop.permute.xlu1 %1786 }
 0x238   :  { %2548 = vmatprep.mubr.bf16.mxu0 %v2698_v41  ;;  %2500 = vmatprep.mubr.msk.bf16.mxu1 %vm96_vm0, %v2729_v42  ;;  %3718 = vst [vmem:[#allocation2_spill] sm:$0xff] %v3402_v40  ;;  %v3406_v42 = vpop.permute.xlu0 %1781 }
 0x239   :  { %3719 = vst [vmem:[#allocation3_spill] sm:$0xff] %v3406_v42 }
 0x23f   :  { %2549 = vmatmul.mubr.bf16.gmra.mrb[28].mxu0 %v2700_v43  ;;  %2501 = vmatmul.mubr.msk.bf16.gmra.mrb[52].mxu1 %vm96_vm0, %v2731_v44  ;;  %v3410_v44 = vpop.permute.xlu1 %1706 }
 0x240   :  { %2552 = vmatprep.mubr.bf16.mxu0 %v2702_v45  ;;  %2087 = vmatprep.mubr.bf16.mxu1 %v2735_v17  ;;  %3720 = vst [vmem:[#allocation4_spill] sm:$0xff] %v3410_v44 }
 0x247   :  { %2553 = vmatmul.mubr.bf16.gmra.mrb[32].mxu0 %v2704_v46  ;;  %v3414_v46 = vpop.permute.xlu0 %1701 }
 0x248   :  { %2556 = vmatprep.mubr.bf16.mxu0 %v2706_v47  ;;  %3721 = vst [vmem:[#allocation5_spill] sm:$0xff] %v3414_v46 }
 0x24f   :  { %2557 = vmatmul.mubr.bf16.gmra.mrb[36].mxu0 %v2708_v48 }
 0x250   :  { %2560 = vmatprep.mubr.bf16.mxu0 %v2710_v49 }
 0x257   :  { %2561 = vmatmul.mubr.bf16.gmra.mrb[40].mxu0 %v2712_v50  ;;  %v3422_v50 = vpop.permute.xlu1 %1796 }
 0x258   :  { %2564 = vmatprep.mubr.bf16.mxu0 %v2714_v51  ;;  %3722 = vst [vmem:[#allocation6_spill] sm:$0xff] %v3422_v50  ;;  %v3424_v51 = vpop.permute.xlu0 %1791 }
 0x259   :  { %3723 = vst [vmem:[#allocation7_spill] sm:$0xff] %v3424_v51 }
 0x25f   :  { %2565 = vmatmul.mubr.bf16.gmra.mrb[44].mxu0 %v2716_v52 }
 0x260   :  { %2568 = vmatprep.mubr.bf16.mxu0 %v2718_v53 }
 0x267   :  { %2569 = vmatmul.mubr.bf16.gmra.mrb[48].mxu0 %v2720_v54 }
 0x268   :  { %2572 = vmatprep.mubr.bf16.mxu0 %v2722_v55 }
 0x26f   :  { %2573 = vmatmul.mubr.bf16.gmra.mrb[52].mxu0 %v2724_v56 }
 0x270   :  { %2576 = vmatprep.mubr.bf16.mxu0 %v2726_v58 }
 0x277   :  { %2577 = vmatmul.mubr.bf16.gmra.mrb[56].mxu0 %v2728_v62 }
 0x278   :  { %2580 = vmatprep.mubr.bf16.mxu0 %v2730_v63 }
 0x27f   :  { %2581 = vmatmul.mubr.bf16.gmra.mrb[60].mxu0 %v2732_v2 }
 0x2ba   :  { %v3372_v25 = vpop.f32.mrb[8].mxu1 }
 0x2bb   :  { %v3376_v27 = vpop.f32.mrb[9].mxu1 }
 0x2bc   :  { %v3378_v28 = vpop.f32.mrb[10].mxu1 }
 0x2bd   :  { %v3380_v29 = vpop.f32.mrb[11].mxu1 }
 0x2c2   :  { %v3386_v32 = vpop.f32.mrb[12].mxu1 }
 0x2c3   :  { %v3388_v33 = vpop.f32.mrb[13].mxu1 }
 0x2c4   :  { %v3390_v34 = vpop.f32.mrb[14].mxu1 }
 0x2c5   :  { %v3392_v35 = vpop.f32.mrb[15].mxu1 }
 0x2ca   :  { %v3398_v38 = vpop.f32.mrb[16].mxu1 }
 0x2cb   :  { %v3400_v39 = vpop.f32.mrb[17].mxu1 }
 0x2cc   :  { %v3404_v41 = vpop.f32.mrb[18].mxu1 }
 0x2cd   :  { %v3408_v43 = vpop.f32.mrb[19].mxu1 }
 0x2d2   :  { %v3412_v45 = vpop.f32.mrb[20].mxu1 }
 0x2d3   :  { %v3416_v47 = vpop.f32.mrb[21].mxu1 }
 0x2d4   :  { %v3418_v48 = vpop.f32.mrb[22].mxu1 }
 0x2d5   :  { %v3420_v49 = vpop.f32.mrb[23].mxu1 }
 0x2da   :  { %v2522_v52 = vpop.f32.mrb[0].mxu0  ;;  %v3426_v53 = vpop.f32.mrb[24].mxu1 }
 0x2db   :  { %3724 = vst [vmem:[#allocation8_spill] sm:$0xff] %v3426_v53  ;;  %v1861_v54 = vadd.f32 %v2522_v52, %v1552_v4  ;;  %v1220_v55 = vpop.f32.mrb[1].mxu0  ;;  %v3428_v56 = vpop.f32.mrb[25].mxu1 }
 0x2dc   :  { %v1859_v58 = vadd.f32 %v3316_v61, %v1220_v55  ;;  %v2523_v62 = vpop.f32.mrb[2].mxu0  ;;  %v3431_v63 = vpop.f32.mrb[26].mxu1 }
 0x2dd   :  { %3725 = vst [vmem:[#allocation9_spill] sm:$0xff] %v3431_v63  ;;  %v1862_v2 = vadd.f32 %v2523_v62, %v1557_v3  ;;  %v1223_v17 = vpop.f32.mrb[3].mxu0  ;;  %v3433_v40 = vpop.f32.mrb[27].mxu1  ;;  %v1925_v42 = vmax.f32 %v1861_v54, 0.0 }
 0x2de   :  { %3726 = vst [vmem:[#allocation10_spill] sm:$0xff] %v3433_v40  ;;  %v1860_v50 = vadd.f32 %v3314_v60, %v1223_v17  ;;  %v1923_v44 = vmax.f32 %v1859_v58, 0.0  ;;  %v3436_v53 = vpop.permute.xlu1 %1716  ;;  %v3438_v4 = vpop.permute.xlu0 %1711 }
 0x2df   :  { %v1926_v51 = vmax.f32 %v1862_v2, 0.0 }
 0x2e0   :  { %v1924_v46 = vmax.f32 %v1860_v50, 0.0 }
 0x2e1   :  { %v3440_v52 = vpack.c.bf16 %v1926_v51, %v1925_v42 }
 0x2e2   :  { %v3442_v61 = vpack.c.bf16 %v1924_v46, %v1923_v44  ;;  %v2526_v55 = vpop.f32.mrb[4].mxu0  ;;  %v3444_v63 = vpop.f32.mrb[28].mxu1 }
 0x2e3   :  { %3727 = vst [vmem:[#allocation11_spill] sm:$0xff] %v3444_v63  ;;  %v1865_v3 = vadd.f32 %v2526_v55, %v3345_v12  ;;  %v1236_v62 = vpop.f32.mrb[5].mxu0  ;;  %v3447_v40 = vpop.f32.mrb[29].mxu1 }
 0x2e4   :  { %3728 = vst [vmem:[#allocation12_spill] sm:$0xff] %v3447_v40  ;;  %v1863_v60 = vadd.f32 %v3337_v8, %v1236_v62  ;;  %v2527_v54 = vpop.f32.mrb[6].mxu0  ;;  %v3450_v50 = vpop.f32.mrb[30].mxu1 }
 0x2e5   :  { %3729 = vst [vmem:[#allocation13_spill] sm:$0xff] %v3450_v50  ;;  %v1866_v58 = vadd.f32 %v2527_v54, %v3343_v11  ;;  %v1239_v2 = vpop.f32.mrb[7].mxu0  ;;  %v3453_v42 = vpop.f32.mrb[31].mxu1  ;;  %v1929_v46 = vmax.f32 %v1865_v3, 0.0 }
 0x2e6   :  { %3730 = vst [vmem:[#allocation14_spill] sm:$0xff] %v3453_v42  ;;  %v1864_v44 = vadd.f32 %v3335_v7, %v1239_v2  ;;  %v1927_v17 = vmax.f32 %v1863_v60, 0.0  ;;  %v3456_v12 = vpop.permute.xlu1 %1806  ;;  %v3458_v55 = vpop.permute.xlu0 %1801 }
 0x2e7   :  { %v1930_v51 = vmax.f32 %v1866_v58, 0.0  ;;  %3731 = vst [vmem:[#allocation15_spill] sm:$0xff] %v3456_v12  ;;  %3732 = vst [vmem:[#allocation16_spill] sm:$0xff] %v3458_v55 }
 0x2e8   :  { %v1928_v63 = vmax.f32 %v1864_v44, 0.0 }
 0x2e9   :  { %v3460_v40 = vpack.c.bf16 %v1930_v51, %v1929_v46 }
 0x2ea   :  { %v3462_v8 = vpack.c.bf16 %v1928_v63, %v1927_v17  ;;  %v2530_v62 = vpop.f32.mrb[8].mxu0  ;;  %v3464_v50 = vpop.f32.mrb[32].mxu1 }
 0x2eb   :  { %v1869_v11 = vadd.f32 %v2530_v62, %v3364_v21  ;;  %v1252_v54 = vpop.f32.mrb[9].mxu0  ;;  %v3467_v42 = vpop.f32.mrb[33].mxu1 }
 0x2ec   :  { %v1867_v7 = vadd.f32 %v3353_v16, %v1252_v54  ;;  %v2531_v3 = vpop.f32.mrb[10].mxu0  ;;  %v3470_v60 = vpop.f32.mrb[34].mxu1 }
 0x2ed   :  { %3733 = vst [vmem:[#allocation17_spill] sm:$0xff] %v3470_v60  ;;  %v1870_v58 = vadd.f32 %v2531_v3, %v3362_v20  ;;  %v1255_v2 = vpop.f32.mrb[11].mxu0  ;;  %v3473_v44 = vpop.f32.mrb[35].mxu1  ;;  %v1933_v46 = vmax.f32 %v1869_v11, 0.0 }
 0x2ee   :  { %3734 = vst [vmem:[#allocation18_spill] sm:$0xff] %v3473_v44  ;;  %v1868_v63 = vadd.f32 %v3351_v15, %v1255_v2  ;;  %v1931_v17 = vmax.f32 %v1867_v7, 0.0  ;;  %v3476_v21 = vpop.permute.xlu1 %1726  ;;  %v3478_v62 = vpop.permute.xlu0 %1721 }
 0x2ef   :  { %v1934_v51 = vmax.f32 %v1870_v58, 0.0 }
 0x2f0   :  { %v1932_v12 = vmax.f32 %v1868_v63, 0.0 }
 0x2f1   :  { %v3480_v55 = vpack.c.bf16 %v1934_v51, %v1933_v46 }
 0x2f2   :  { %v3482_v16 = vpack.c.bf16 %v1932_v12, %v1931_v17  ;;  %v2534_v54 = vpop.f32.mrb[12].mxu0  ;;  %v3484_v60 = vpop.f32.mrb[36].mxu1 }
 0x2f3   :  { %3735 = vst [vmem:[#allocation19_spill] sm:$0xff] %v3484_v60  ;;  %v1873_v20 = vadd.f32 %v2534_v54, %v3396_v37  ;;  %v1268_v3 = vpop.f32.mrb[13].mxu0  ;;  %v3487_v44 = vpop.f32.mrb[37].mxu1 }
 0x2f4   :  { %3736 = vst [vmem:[#allocation20_spill] sm:$0xff] %v3487_v44  ;;  %v1871_v15 = vadd.f32 %v3374_v26, %v1268_v3  ;;  %v2535_v11 = vpop.f32.mrb[14].mxu0  ;;  %v3490_v7 = vpop.f32.mrb[38].mxu1 }
 0x2f5   :  { %3737 = vst [vmem:[#allocation21_spill] sm:$0xff] %v3490_v7  ;;  %v1874_v58 = vadd.f32 %v2535_v11, %v3394_v36  ;;  %v1271_v2 = vpop.f32.mrb[15].mxu0  ;;  %v3493_v63 = vpop.f32.mrb[39].mxu1  ;;  %v1937_v46 = vmax.f32 %v1873_v20, 0.0 }
 0x2f6   :  { %3738 = vst [vmem:[#allocation22_spill] sm:$0xff] %v3493_v63  ;;  %v1872_v12 = vadd.f32 %v3370_v24, %v1271_v2  ;;  %v1935_v17 = vmax.f32 %v1871_v15, 0.0  ;;  %v3496_v37 = vpop.permute.xlu1 %1816  ;;  %v3498_v54 = vpop.permute.xlu0 %1811 }
 0x2f7   :  { %v1938_v51 = vmax.f32 %v1874_v58, 0.0  ;;  %3739 = vst [vmem:[#allocation23_spill] sm:$0xff] %v3496_v37  ;;  %3740 = vst [vmem:[#allocation24_spill] sm:$0xff] %v3498_v54 }
 0x2f8   :  { %v1936_v60 = vmax.f32 %v1872_v12, 0.0 }
 0x2f9   :  { %v3500_v44 = vpack.c.bf16 %v1938_v51, %v1937_v46 }
 0x2fa   :  { %v3502_v26 = vpack.c.bf16 %v1936_v60, %v1935_v17  ;;  %v2538_v3 = vpop.f32.mrb[16].mxu0  ;;  %v3504_v7 = vpop.f32.mrb[40].mxu1 }
 0x2fb   :  { %v1293_v36 = vadd.f32 %v2538_v3, %v3372_v25  ;;  %v1284_v11 = vpop.f32.mrb[17].mxu0  ;;  %v3507_v63 = vpop.f32.mrb[41].mxu1 }
 0x2fc   :  { %v1285_v24 = vadd.f32 %v1284_v11, %v3376_v27  ;;  %v2539_v20 = vpop.f32.mrb[18].mxu0  ;;  %v3510_v15 = vpop.f32.mrb[42].mxu1 }
 0x2fd   :  { %v1877_v58 = vadd.f32 %v3326_v1, %v1293_v36  ;;  %v1296_v2 = vadd.f32 %v2539_v20, %v3378_v28  ;;  %v1287_v12 = vpop.f32.mrb[19].mxu0  ;;  %v3514_v60 = vpop.f32.mrb[43].mxu1 }
 0x2fe   :  { %v1875_v46 = vadd.f32 %v3312_v59, %v1285_v24  ;;  %v1288_v51 = vadd.f32 %v1287_v12, %v3380_v29  ;;  %v3520_v3 = vpop.permute.xlu1 %1736  ;;  %v3522_v27 = vpop.permute.xlu0 %1731 }
 0x2ff   :  { %v1878_v25 = vadd.f32 %v3324_v0, %v1296_v2  ;;  %v1941_v11 = vmax.f32 %v1877_v58, 0.0 }
 0x300   :  { %v1876_v17 = vadd.f32 %v3307_v57, %v1288_v51  ;;  %v1939_v1 = vmax.f32 %v1875_v46, 0.0 }
 0x301   :  { %v1942_v37 = vmax.f32 %v1878_v25, 0.0 }
 0x302   :  { %v1940_v36 = vmax.f32 %v1876_v17, 0.0  ;;  %v2542_v28 = vpop.f32.mrb[20].mxu0  ;;  %v3524_v20 = vpop.f32.mrb[44].mxu1 }
 0x303   :  { %v1309_v54 = vadd.f32 %v2542_v28, %v3386_v32  ;;  %v1300_v59 = vpop.f32.mrb[21].mxu0  ;;  %v2000_v24 = vpack.c.bf16 %v1942_v37, %v1941_v11  ;;  %v3527_v29 = vpop.f32.mrb[45].mxu1 }
 0x304   :  { %v1301_v0 = vadd.f32 %v1300_v59, %v3388_v33  ;;  %v2543_v57 = vpop.f32.mrb[22].mxu0  ;;  %v1999_v2 = vpack.c.bf16 %v1940_v36, %v1939_v1  ;;  %v3530_v12 = vpop.f32.mrb[46].mxu1 }
 0x305   :  { %v1881_v58 = vadd.f32 %v3341_v10, %v1309_v54  ;;  %v1312_v46 = vadd.f32 %v2543_v57, %v3390_v34  ;;  %v1303_v51 = vpop.f32.mrb[23].mxu0  ;;  %v3534_v25 = vpop.f32.mrb[47].mxu1 }
 0x306   :  { %v1879_v17 = vadd.f32 %v3333_v6, %v1301_v0  ;;  %v1304_v32 = vadd.f32 %v1303_v51, %v3392_v35  ;;  %2376 = vmatprep.subr.bf16.mxu1 %v1999_v2  ;;  %v3541_v11 = vpop.permute.xlu1 %1826  ;;  %v3543_v10 = vpop.permute.xlu0 %1821 }
 0x307   :  { %v1882_v37 = vadd.f32 %v3339_v9, %v1312_v46  ;;  %2377 = vmatpush3.bf16.msra.mxu1 %v3442_v61  ;;  %v1945_v34 = vmax.f32 %v1881_v58, 0.0 }
 0x308   :  { %v1880_v33 = vadd.f32 %v3331_v5, %v1304_v32  ;;  %2378 = vmatprep.subr.bf16.mxu1 %v2000_v24  ;;  %v1943_v1 = vmax.f32 %v1879_v17, 0.0 }
 0x309   :  { %v1946_v54 = vmax.f32 %v1882_v37, 0.0 }
 0x30a   :  { %v1944_v36 = vmax.f32 %v1880_v33, 0.0  ;;  %v2546_v28 = vpop.f32.mrb[24].mxu0  ;;  %v3545_v6 = vpop.f32.mrb[48].mxu1 }
 0x30b   :  { %v1325_v35 = vadd.f32 %v2546_v28, %v3398_v38  ;;  %v1316_v59 = vpop.f32.mrb[25].mxu0  ;;  %2379 = vmatpush3.bf16.msra.mxu1 %v3440_v52  ;;  %v2002_v9 = vpack.c.bf16 %v1946_v54, %v1945_v34  ;;  %v3549_v61 = vpop.f32.mrb[49].mxu1 }
 0x30c   :  { %v1317_v5 = vadd.f32 %v1316_v59, %v3400_v39  ;;  %v2547_v24 = vpop.f32.mrb[26].mxu0  ;;  %v2001_v0 = vpack.c.bf16 %v1944_v36, %v1943_v1  ;;  %v3552_v57 = vpop.f32.mrb[50].mxu1 }
 0x30d   :  { %v1885_v2 = vadd.f32 %v3360_v19, %v1325_v35  ;;  %v1328_v58 = vadd.f32 %v2547_v24, %v3404_v41  ;;  %v1319_v46 = vpop.f32.mrb[27].mxu0  ;;  %v3556_v51 = vpop.f32.mrb[51].mxu1 }
 0x30e   :  { %v1883_v38 = vadd.f32 %v3349_v14, %v1317_v5  ;;  %v1320_v52 = vadd.f32 %v1319_v46, %v3408_v43  ;;  %2380 = vmatprep.subr.bf16.mxu1 %v2001_v0  ;;  %v3562_v39 = vpop.permute.xlu0 %1741  ;;  %v3565_v19 = vpop.permute.xlu1 %1746 }
 0x30f   :  { %v1886_v17 = vadd.f32 %v3358_v18, %v1328_v58  ;;  %2381 = vmatpush3.bf16.msra.mxu1 %v3462_v8  ;;  %v1949_v41 = vmax.f32 %v1885_v2, 0.0 }
 0x310   :  { %v1884_v32 = vadd.f32 %v3347_v13, %v1320_v52  ;;  %2382 = vmatprep.subr.bf16.mxu1 %v2002_v9  ;;  %v1947_v33 = vmax.f32 %v1883_v38, 0.0 }
 0x311   :  { %v1950_v37 = vmax.f32 %v1886_v17, 0.0  ;;  %v3741_v17 = vld [vmem:[#allocation8_spill] sm:$0xff] }
 0x312   :  { %v1948_v34 = vmax.f32 %v1884_v32, 0.0  ;;  %v2550_v54 = vpop.f32.mrb[28].mxu0  ;;  %v3567_v14 = vpop.f32.mrb[52].mxu1 }
 0x313   :  { %v1341_v43 = vadd.f32 %v2550_v54, %v3412_v45  ;;  %v1332_v1 = vpop.f32.mrb[29].mxu0  ;;  %2383 = vmatpush3.bf16.msra.mxu1 %v3460_v40  ;;  %v2004_v18 = vpack.c.bf16 %v1950_v37, %v1949_v41  ;;  %v3571_v8 = vpop.f32.mrb[53].mxu1 }
 0x314   :  { %v1333_v13 = vadd.f32 %v1332_v1, %v3416_v47  ;;  %v2551_v36 = vpop.f32.mrb[30].mxu0  ;;  %v2003_v28 = vpack.c.bf16 %v1948_v34, %v1947_v33  ;;  %v3574_v35 = vpop.f32.mrb[54].mxu1  ;;  %v3743_v1 = vld [vmem:[#allocation5_spill] sm:$0xff] }
 0x315   :  { %v1889_v59 = vadd.f32 %v3384_v31, %v1341_v43  ;;  %v1344_v9 = vadd.f32 %v2551_v36, %v3418_v48  ;;  %v1335_v5 = vpop.f32.mrb[31].mxu0  ;;  %v3578_v24 = vpop.f32.mrb[55].mxu1 }
 0x316   :  { %v3580_v45 = vpop.permute.xlu0 %1831  ;;  %v1887_v40 = vadd.f32 %v3368_v23, %v1333_v13  ;;  %v1336_v0 = vadd.f32 %v1335_v5, %v3420_v49  ;;  %2384 = vmatprep.subr.bf16.mxu1 %v2003_v28  ;;  %v3586_v2 = vpop.permute.xlu1 %1836  ;;  %v3744_v13 = vld [vmem:[#allocation10_spill] sm:$0xff] }
 0x317   :  { %v1890_v47 = vadd.f32 %v3382_v30, %v1344_v9  ;;  %2385 = vmatpush3.bf16.msra.mxu1 %v3482_v16  ;;  %v1953_v48 = vmax.f32 %v1889_v59, 0.0 }
 0x318   :  { %v1888_v31 = vadd.f32 %v3366_v22, %v1336_v0  ;;  %2386 = vmatprep.subr.bf16.mxu1 %v2004_v18  ;;  %v1951_v46 = vmax.f32 %v1887_v40, 0.0  ;;  %v3742_v22 = vld [vmem:[#allocation9_spill] sm:$0xff] }
 0x319   :  { %v1954_v58 = vmax.f32 %v1890_v47, 0.0  ;;  %v2733_v47 = vld [vmem:[%s3715_s10] ss:$16 sps:$4 sm:$0xff]  }
 0x31a   :  { %v1952_v38 = vmax.f32 %v1888_v31, 0.0  ;;  %v2554_v52 = vpop.f32.mrb[32].mxu0  ;;  %v1752_v41 = vpop.permute.xlu0 %1751 }
 0x31b   :  { %v1357_v32 = vadd.f32 %v2554_v52, %v3741_v17  ;;  %v1348_v23 = vpop.f32.mrb[33].mxu0  ;;  %2387 = vmatpush3.bf16.msra.mxu1 %v3480_v55  ;;  %v2006_v49 = vpack.c.bf16 %v1954_v58, %v1953_v48  ;;  %v1757_v43 = vpop.permute.xlu1 %1756  ;;  %v3745_v55 = vld [vmem:[#allocation4_spill] sm:$0xff]  ;;  %v3746_v48 = vld [vmem:[#allocation11_spill] sm:$0xff] }
 0x31c   :  { %v1349_v30 = vadd.f32 %v1348_v23, %v3428_v56  ;;  %v2555_v16 = vpop.f32.mrb[34].mxu0  ;;  %v2005_v37 = vpack.c.bf16 %v1952_v38, %v1951_v46  ;;  %v3747_v52 = vld [vmem:[#allocation12_spill] sm:$0xff] }
 0x31d   :  { %v1893_v33 = vadd.f32 %v3438_v4, %v1357_v32  ;;  %v1360_v34 = vadd.f32 %v2555_v16, %v3742_v22  ;;  %v1351_v54 = vpop.f32.mrb[35].mxu0 }
 0x31e   :  { %v1891_v18 = vadd.f32 %v3743_v1, %v1349_v30  ;;  %v1352_v36 = vadd.f32 %v1351_v54, %v3744_v13  ;;  %2388 = vmatprep.subr.bf16.mxu1 %v2005_v37  ;;  %v3599_v5 = vpop.permute.xlu0 %1841 }
 0x31f   :  { %v1894_v28 = vadd.f32 %v3436_v53, %v1360_v34  ;;  %2389 = vmatpush3.bf16.msra.mxu1 %v3502_v26  ;;  %v1957_v56 = vmax.f32 %v1893_v33, 0.0  ;;  %v2738_v26 = vld [vmem:[%s3715_s10 + $0xc] ss:$16 sps:$4 sm:$0xff]   ;;  %v3611_v46 = vpop.permute.xlu1 %1846  ;;  %v3749_v33 = vld [vmem:[#allocation14_spill] sm:$0xff] }
 0x320   :  { %v1892_v59 = vadd.f32 %v3745_v55, %v1352_v36  ;;  %2390 = vmatprep.subr.bf16.mxu1 %v2006_v49  ;;  %v1955_v4 = vmax.f32 %v1891_v18, 0.0  ;;  %v3748_v49 = vld [vmem:[#allocation13_spill] sm:$0xff] }
 0x321   :  { %v1958_v9 = vmax.f32 %v1894_v28, 0.0 }
 0x322   :  { %v1956_v40 = vmax.f32 %v1892_v59, 0.0  ;;  %v2558_v0 = vpop.f32.mrb[36].mxu0  ;;  %v1762_v34 = vpop.permute.xlu0 %1761 }
 0x323   :  { %v3604_v31 = vpack.c.bf16 %v1958_v9, %v1957_v56  ;;  %v1373_v53 = vadd.f32 %v2558_v0, %v3746_v48  ;;  %v1364_v58 = vpop.f32.mrb[37].mxu0  ;;  %2391 = vmatpush3.bf16.msra.mxu1 %v3500_v44  ;;  %v1767_v13 = vpop.permute.xlu1 %1766 }
 0x324   :  { %v3613_v38 = vpack.c.bf16 %v1956_v40, %v1955_v4  ;;  %v1365_v17 = vadd.f32 %v1364_v58, %v3747_v52  ;;  %v2559_v32 = vpop.f32.mrb[38].mxu0  ;;  %v3750_v40 = vld [vmem:[#allocation17_spill] sm:$0xff] }
 0x325   :  { %v1897_v23 = vadd.f32 %v3522_v27, %v1373_v53  ;;  %v1376_v30 = vadd.f32 %v2559_v32, %v3748_v49  ;;  %v1367_v16 = vpop.f32.mrb[39].mxu0  ;;  %v3751_v53 = vld [vmem:[#allocation18_spill] sm:$0xff] }
 0x326   :  { %v1895_v37 = vadd.f32 %v3478_v62, %v1365_v17  ;;  %v1368_v44 = vadd.f32 %v1367_v16, %v3749_v33  ;;  %2088 = vmatmul.mubr.bf16.vlgmr.msra.gmra.mrb[56].mxu1 %v2733_v47  ;;  %v3629_v47 = vpop.permute.xlu0 %1851 }
 0x327   :  { %v1898_v22 = vadd.f32 %v3520_v3, %v1376_v30  ;;  %2128 = vmatprep.mubr.bf16.mxu1 %v2738_v26  ;;  %v1961_v1 = vmax.f32 %v1897_v23, 0.0  ;;  %v3633_v52 = vpop.permute.xlu1 %1856  ;;  %v3752_v30 = vld [vmem:[#allocation19_spill] sm:$0xff] }
 0x328   :  { %v1896_v54 = vadd.f32 %v3476_v21, %v1368_v44  ;;  %v1959_v36 = vmax.f32 %v1895_v37, 0.0 }
 0x329   :  { %v1962_v18 = vmax.f32 %v1898_v22, 0.0 }
 0x32a   :  { %v1960_v28 = vmax.f32 %v1896_v54, 0.0  ;;  %v2562_v27 = vpop.f32.mrb[40].mxu0  ;;  %v1772_v33 = vpop.permute.xlu0 %1771 }
 0x32b   :  { %v3622_v55 = vpack.c.bf16 %v1962_v18, %v1961_v1  ;;  %v1389_v59 = vadd.f32 %v2562_v27, %v3464_v50  ;;  %v1380_v62 = vpop.f32.mrb[41].mxu0  ;;  %v3754_v1 = vld [vmem:[#allocation21_spill] sm:$0xff]  ;;  %v3755_v27 = vld [vmem:[#allocation22_spill] sm:$0xff] }
 0x32c   :  { %v3625_v56 = vpack.c.bf16 %v1960_v28, %v1959_v36  ;;  %v1381_v9 = vadd.f32 %v1380_v62, %v3467_v42  ;;  %v2563_v3 = vpop.f32.mrb[42].mxu0  ;;  %v1777_v36 = vpop.permute.xlu1 %1776 }
 0x32d   :  { %v1901_v4 = vadd.f32 %v1752_v41, %v1389_v59  ;;  %v1392_v0 = vadd.f32 %v2563_v3, %v3750_v40  ;;  %v1383_v21 = vpop.f32.mrb[43].mxu0 }
 0x32e   :  { %v1899_v48 = vadd.f32 %v3562_v39, %v1381_v9  ;;  %v1384_v58 = vadd.f32 %v1383_v21, %v3751_v53  ;;  %v3753_v39 = vld [vmem:[#allocation20_spill] sm:$0xff] }
 0x32f   :  { %v1902_v26 = vadd.f32 %v1757_v43, %v1392_v0  ;;  %v1965_v17 = vmax.f32 %v1901_v4, 0.0 }
 0x330   :  { %v1900_v50 = vadd.f32 %v3565_v19, %v1384_v58  ;;  %v1963_v23 = vmax.f32 %v1899_v48, 0.0 }
 0x331   :  { %v1966_v32 = vmax.f32 %v1902_v26, 0.0 }
 0x332   :  { %v1964_v42 = vmax.f32 %v1900_v50, 0.0  ;;  %v2566_v49 = vpop.f32.mrb[44].mxu0 }
 0x333   :  { %v3636_v41 = vpack.c.bf16 %v1966_v32, %v1965_v17  ;;  %v1405_v16 = vadd.f32 %v2566_v49, %v3752_v30  ;;  %v1396_v37 = vpop.f32.mrb[45].mxu0 }
 0x334   :  { %v3639_v44 = vpack.c.bf16 %v1964_v42, %v1963_v23  ;;  %v1397_v22 = vadd.f32 %v1396_v37, %v3753_v39  ;;  %v2567_v43 = vpop.f32.mrb[46].mxu0  ;;  %v3757_v42 = vld [vmem:[#allocation3_spill] sm:$0xff] }
 0x335   :  { %v1905_v54 = vadd.f32 %v1772_v33, %v1405_v16  ;;  %v1408_v18 = vadd.f32 %v2567_v43, %v3754_v1  ;;  %v1399_v19 = vpop.f32.mrb[47].mxu0  ;;  %v3758_v16 = vld [vmem:[#allocation6_spill] sm:$0xff] }
 0x336   :  { %v1903_v28 = vadd.f32 %v1762_v34, %v1397_v22  ;;  %v1400_v59 = vadd.f32 %v1399_v19, %v3755_v27  ;;  %v3756_v34 = vld [vmem:[#allocation7_spill] sm:$0xff]  ;;  %v3759_v33 = vld [vmem:[#allocation2_spill] sm:$0xff]  ;;  %v3760_v27 = vld [vmem:[#allocation24_spill] sm:$0xff] }
 0x337   :  { %v1906_v62 = vadd.f32 %v1777_v36, %v1408_v18  ;;  %v1969_v3 = vmax.f32 %v1905_v54, 0.0 }
 0x338   :  { %v1904_v9 = vadd.f32 %v1767_v13, %v1400_v59  ;;  %v1967_v40 = vmax.f32 %v1903_v28, 0.0 }
 0x339   :  { %v1970_v4 = vmax.f32 %v1906_v62, 0.0 }
 0x33a   :  { %v1968_v0 = vmax.f32 %v1904_v9, 0.0  ;;  %v2570_v21 = vpop.f32.mrb[48].mxu0  ;;  %v3761_v9 = vld [vmem:[#allocation16_spill] sm:$0xff] }
 0x33b   :  { %v3644_v48 = vpack.c.bf16 %v1970_v4, %v1969_v3  ;;  %v1421_v53 = vadd.f32 %v2570_v21, %v3504_v7  ;;  %v1412_v58 = vpop.f32.mrb[49].mxu0 }
 0x33c   :  { %v3647_v26 = vpack.c.bf16 %v1968_v0, %v1967_v40  ;;  %v1413_v50 = vadd.f32 %v1412_v58, %v3507_v63  ;;  %v2571_v17 = vpop.f32.mrb[50].mxu0  ;;  %v3762_v40 = vld [vmem:[#allocation23_spill] sm:$0xff] }
 0x33d   :  { %v1909_v32 = vadd.f32 %v3756_v34, %v1421_v53  ;;  %v1424_v23 = vadd.f32 %v2571_v17, %v3510_v15  ;;  %v1415_v13 = vpop.f32.mrb[51].mxu0 }
 0x33e   :  { %v1907_v49 = vadd.f32 %v3757_v42, %v1413_v50  ;;  %v1416_v30 = vadd.f32 %v1415_v13, %v3514_v60 }
 0x33f   :  { %v1910_v37 = vadd.f32 %v3758_v16, %v1424_v23  ;;  %v1973_v7 = vmax.f32 %v1909_v32, 0.0 }
 0x340   :  { %v1908_v39 = vadd.f32 %v3759_v33, %v1416_v30  ;;  %v1971_v43 = vmax.f32 %v1907_v49, 0.0 }
 0x341   :  { %v1974_v22 = vmax.f32 %v1910_v37, 0.0 }
 0x342   :  { %v1972_v54 = vmax.f32 %v1908_v39, 0.0  ;;  %v2574_v1 = vpop.f32.mrb[52].mxu0 }
 0x343   :  { %v1437_v63 = vadd.f32 %v2574_v1, %v3524_v20  ;;  %v1428_v18 = vpop.f32.mrb[53].mxu0  ;;  %v2016_v19 = vpack.c.bf16 %v1974_v22, %v1973_v7  ;;  %v3763_v20 = vld [vmem:[#allocation15_spill] sm:$0xff] }
 0x344   :  { %v1429_v15 = vadd.f32 %v1428_v18, %v3527_v29  ;;  %v2575_v36 = vpop.f32.mrb[54].mxu0  ;;  %v2015_v28 = vpack.c.bf16 %v1972_v54, %v1971_v43 }
 0x345   :  { %v1913_v59 = vadd.f32 %v3760_v27, %v1437_v63  ;;  %v1440_v60 = vadd.f32 %v2575_v36, %v3530_v12  ;;  %v1431_v62 = vpop.f32.mrb[55].mxu0 }
 0x346   :  { %v1911_v3 = vadd.f32 %v3761_v9, %v1429_v15  ;;  %v1432_v4 = vadd.f32 %v1431_v62, %v3534_v25  ;;  %2398 = vmatprep.subr.bf16.mxu1 %v2015_v28  ;;  %v2028_v28 = vpop.permute.xlu0 %2027  ;;  %v2033_v62 = vpop.permute.xlu1 %2032 }
 0x347   :  { %v1914_v0 = vadd.f32 %v3762_v40, %v1440_v60  ;;  %2399 = vmatpush3.bf16.msra.mxu1 %v3613_v38  ;;  %v1977_v29 = vmax.f32 %v1913_v59, 0.0 }
 0x348   :  { %v1912_v21 = vadd.f32 %v3763_v20, %v1432_v4  ;;  %2400 = vmatprep.subr.bf16.mxu1 %v2016_v19  ;;  %v1975_v58 = vmax.f32 %v1911_v3, 0.0 }
 0x349   :  { %v1978_v53 = vmax.f32 %v1914_v0, 0.0 }
 0x34a   :  { %v1976_v50 = vmax.f32 %v1912_v21, 0.0  ;;  %v2578_v17 = vpop.f32.mrb[56].mxu0 }
 0x34b   :  { %v1453_v12 = vadd.f32 %v2578_v17, %v3545_v6  ;;  %v1444_v34 = vpop.f32.mrb[57].mxu0  ;;  %2401 = vmatpush3.bf16.msra.mxu1 %v3604_v31  ;;  %v2018_v32 = vpack.c.bf16 %v1978_v53, %v1977_v29 }
 0x34c   :  { %v1445_v25 = vadd.f32 %v1444_v34, %v3549_v61  ;;  %v2579_v23 = vpop.f32.mrb[58].mxu0  ;;  %v2017_v13 = vpack.c.bf16 %v1976_v50, %v1975_v58 }
 0x34d   :  { %v1917_v38 = vadd.f32 %v3580_v45, %v1453_v12  ;;  %v1456_v42 = vadd.f32 %v2579_v23, %v3552_v57  ;;  %v1447_v49 = vpop.f32.mrb[59].mxu0 }
 0x34e   :  { %v1915_v30 = vadd.f32 %v3543_v10, %v1445_v25  ;;  %v1448_v16 = vadd.f32 %v1447_v49, %v3556_v51  ;;  %2402 = vmatprep.subr.bf16.mxu1 %v2017_v13 }
 0x34f   :  { %v1918_v6 = vadd.f32 %v3586_v2, %v1456_v42  ;;  %2403 = vmatpush3.bf16.msra.mxu1 %v3625_v56  ;;  %v1981_v61 = vmax.f32 %v1917_v38, 0.0 }
 0x350   :  { %v1916_v31 = vadd.f32 %v3541_v11, %v1448_v16  ;;  %2404 = vmatprep.subr.bf16.mxu1 %v2018_v32  ;;  %v1979_v33 = vmax.f32 %v1915_v30, 0.0 }
 0x351   :  { %v1982_v37 = vmax.f32 %v1918_v6, 0.0 }
 0x352   :  { %v1980_v39 = vmax.f32 %v1916_v31, 0.0  ;;  %v2582_v45 = vpop.f32.mrb[60].mxu0  ;;  %v2159_v31 = vld [vmem:[%s3717_s2] sm:$0xff] }
 0x353   :  { %v1469_v57 = vadd.f32 %v2582_v45, %v3567_v14  ;;  %v1460_v7 = vpop.f32.mrb[61].mxu0  ;;  %2405 = vmatpush3.bf16.msra.mxu1 %v3622_v55  ;;  %v2020_v10 = vpack.c.bf16 %v1982_v37, %v1981_v61 }
 0x354   :  { %v1461_v51 = vadd.f32 %v1460_v7, %v3571_v8  ;;  %v2583_v22 = vpop.f32.mrb[62].mxu0  ;;  %v2019_v2 = vpack.c.bf16 %v1980_v39, %v1979_v33 }
 0x355   :  { %v1921_v56 = vadd.f32 %v3629_v47, %v1469_v57  ;;  %v1472_v11 = vadd.f32 %v2583_v22, %v3574_v35  ;;  %v1463_v43 = vpop.f32.mrb[63].mxu0 }
 0x356   :  { %v1919_v54 = vadd.f32 %v3599_v5, %v1461_v51  ;;  %v1464_v1 = vadd.f32 %v1463_v43, %v3578_v24  ;;  %2406 = vmatprep.subr.bf16.mxu1 %v2019_v2  ;;  %v2736_v24 = vld [vmem:[%s3715_s10 + $0x8] ss:$16 sps:$4 sm:$0xff]  }
 0x357   :  { %v1922_v14 = vadd.f32 %v3633_v52, %v1472_v11  ;;  %2407 = vmatpush3.bf16.msra.mxu1 %v3639_v44  ;;  %v1985_v8 = vmax.f32 %v1921_v56, 0.0 }
 0x358   :  { %v1920_v55 = vadd.f32 %v3611_v46, %v1464_v1  ;;  %2408 = vmatprep.subr.bf16.mxu1 %v2020_v10  ;;  %v1983_v18 = vmax.f32 %v1919_v54, 0.0 }
 0x359   :  { %v1986_v63 = vmax.f32 %v1922_v14, 0.0 }
 0x35a   :  { %v1984_v19 = vmax.f32 %v1920_v55, 0.0 }
 0x35b   :  { %2409 = vmatpush3.bf16.msra.mxu1 %v3636_v41  ;;  %v2022_v35 = vpack.c.bf16 %v1986_v63, %v1985_v8 }
 0x35c   :  { %v2021_v47 = vpack.c.bf16 %v1984_v19, %v1983_v18 }
 0x35e   :  { %2410 = vmatprep.subr.bf16.mxu1 %v2021_v47 }
 0x35f   :  { %2411 = vmatpush3.bf16.msra.mxu1 %v3647_v26 }
 0x360   :  { %2412 = vmatprep.subr.bf16.mxu1 %v2022_v35 }
 0x363   :  { %2413 = vmatpush3.bf16.msra.mxu1 %v3644_v48 }
 0x366   :  { %2129 = vmatmul.mubr.bf16.vlgmr.msra.gmra.mrb[60].mxu1 %v2736_v24 }
 0x3f9   :  { %v2392_v5 = vpop.f32.mrb[56].mxu1 }
 0x3fa   :  { %v2393_v46 = vpop.f32.mrb[57].mxu1 }
 0x3fb   :  { %v2394_v52 = vadd.f32 %v2393_v46, %v2392_v5  ;;  %v2395_v44 = vpop.f32.mrb[58].mxu1 }
 0x3fc   :  { %v2396_v15 = vpop.f32.mrb[59].mxu1 }
 0x3fd   :  { %v2397_v36 = vadd.f32 %v2396_v15, %v2395_v44  ;;  %v2090_v59 = vadd.f32 %v2394_v52, %v2028_v28 }
 0x3ff   :  { %v2093_v3 = vadd.f32 %v2397_v36, %v2033_v62 }
 0x439   :  { %v2414_v41 = vpop.f32.mrb[60].mxu1 }
 0x43a   :  { %v2415_v27 = vpop.f32.mrb[61].mxu1 }
 0x43b   :  { %v2416_v60 = vadd.f32 %v2415_v27, %v2414_v41  ;;  %v2417_v26 = vpop.f32.mrb[62].mxu1 }
 0x43c   :  { %v2418_v9 = vpop.f32.mrb[63].mxu1 }
 0x43d   :  { %v2131_v4 = vadd.f32 %v2416_v60, %v2090_v59  ;;  %v2419_v40 = vadd.f32 %v2418_v9, %v2417_v26 }
 0x43f   :  { %v2137_v48 = vmax.f32 %v2131_v4, 0.0  ;;  %v2134_v0 = vadd.f32 %v2419_v40, %v2093_v3 }
 0x441   :  { %v2140_v20 = vsel %vm2139_vm1, %v2137_v48, -inf  ;;  %v2138_v21 = vmax.f32 %v2134_v0, 0.0 }
 0x442   :  { %v2141_v29 = vrot.slane %v2140_v20, 4 }
 0x443   :  { %2171 = vst.msk [vmem:[%s3716_s12 + $0x8] sm:$0xff] %vm2139_vm1, %v2138_v21 }
 0x444   :  { %v2142_v53 = vmax.f32 %v2140_v20, %v2141_v29 }
 0x446   :  { %v2143_v58 = vrot.slane %v2142_v53, 2 }
 0x448   :  { %v2144_v50 = vmax.f32 %v2142_v53, %v2143_v58 }
 0x44a   :  { %v2145_v17 = vrot.slane %v2144_v50, 1 }
 0x44c   :  { %v2146_v12 = vmax.f32 %v2144_v50, %v2145_v17 }
 0x44e   :  { %v2147_v34 = vsub.f32 %v2137_v48, %v2146_v12 }
 0x450   :  { %v2148_v32 = vmul.f32 1.442695, %v2147_v34 }
 0x452   :  { %2755 = vpow2.f32 %v2148_v32 }
 0x45c   :  { %v2756_v25 = vpop.eup %2755 }
 0x45d   :  { %v2150_v23 = vsel %vm2139_vm1, %v2756_v25, 0.0 }
 0x45e   :  { %v2151_v13 = vrot.slane %v2150_v23, 4 }
 0x460   :  { %v2152_v38 = vadd.f32 %v2151_v13, %v2150_v23 }
 0x462   :  { %v2153_v42 = vrot.slane %v2152_v38, 2 }
 0x464   :  { %v2154_v49 = vadd.f32 %v2153_v42, %v2152_v38 }
 0x466   :  { %v2155_v30 = vrot.slane %v2154_v49, 1 }
 0x468   :  { %v2156_v16 = vadd.f32 %v2155_v30, %v2154_v49 }
 0x46a   :  { %2757 = vrcp.f32 %v2156_v16 }
 0x474   :  { %v2758_v6 = vpop.eup %2757 }
 0x475   :  { %v2158_v61 = vmul.f32 %v2758_v6, %v2756_v25 }
 0x477   :  { %v2160_v37 = vmul.f32 %v2159_v31, %v2158_v61 }
 0x479   :  { %v2161_v33 = vsel %vm2139_vm1, %v2160_v37, 0.0 }
 0x47a   :  { %v2162_v39 = vrot.slane %v2161_v33, 4 }
 0x47c   :  { %v2163_v45 = vadd.f32 %v2162_v39, %v2161_v33 }
 0x47e   :  { %v2164_v57 = vrot.slane %v2163_v45, 2 }
 0x480   :  { %v2165_v7 = vadd.f32 %v2164_v57, %v2163_v45 }
 0x482   :  { %v2166_v10 = vrot.slane %v2165_v7, 1 }
 0x484   :  { %v2167_v51 = vadd.f32 %v2166_v10, %v2165_v7 }
 0x486   :  { %2759 = vrcp.f32 %v2167_v51 }
 0x490   :  { %v2760_v22 = vpop.eup %2759 }
 0x491   :  { %v2169_v2 = vmul.f32 %v2760_v22, %v2160_v37 }
 0x493   :  { %2170 = vst.msk [vmem:[%s3716_s12] sm:$0xff] %vm2139_vm1, %v2169_v2 }

</bundles_post_ra>
